<compile_context>
chip_gen: v5e
topology: v5e:2x2
jax: 0.10.0
libtpu: 0.0.40
codegen_flags: <defaults>
</compile_context>

<pallas_src>
import functools

import jax
import jax.numpy as jnp
import numpy as np
from jax.experimental import pallas as pl
from jax.experimental.pallas import tpu as pltpu

EPS = 1e-5


def _resblock_kernel(xp_ref, w1_ref, w2_ref, row_ref, col_ref, o_ref, *,
                     C, H, W):
    """Fused ResidualBlock for one batch element.

    xp_ref : (1, C, L)   reflect-padded input, spatially flattened,
                         L = (H+2)*(W+2)
    w1_ref : (9, C, C)   conv1 weights, [dy*3+dx, co, ci]   (VMEM)
    w2_ref : (9, C, C)   conv2 weights, same layout          (VMEM)
    row_ref: (1, L)      row index of each flat position     (int32)
    col_ref: (1, L)      col index of each flat position     (int32)
    o_ref  : (1, C, L)   output, padded-flat layout (the 1-pixel border is
                         garbage and is cropped by the wrapper)
    """
    Hp, Wp = H + 2, W + 2
    inv_n = 1.0 / float(H * W)

    row = row_ref[...]                       # (1, L) int32
    col = col_ref[...]                       # (1, L) int32
    interior = ((row >= 1) & (row <= H) &
                (col >= 1) & (col <= W)).astype(jnp.float32)   # (1, L)

    def shift(x, o):
        # S[:, j] = x[:, j + o]  (circular; wrapped lanes only ever land on
        # border positions whose values are never used).
        if o == 0:
            return x
        return jnp.concatenate([x[:, o:], x[:, :o]], axis=1)

    # 3x3 tap offsets in the padded-flat index space.
    tap_offsets = [(dy - 1) * Wp + (dx - 1)
                   for dy in range(3) for dx in range(3)]

    def conv_instnorm(p, w_ref, relu):
        # Shift-and-matmul im2col: 9 accumulating MXU dots, f32 accumulation.
        acc = jnp.dot(w_ref[0], shift(p, tap_offsets[0]),
                      preferred_element_type=jnp.float32)        # (C, L)
        for t in range(1, 9):
            acc = acc + jnp.dot(w_ref[t], shift(p, tap_offsets[t]),
                                preferred_element_type=jnp.float32)
        # InstanceNorm2d (affine=False, biased variance) over interior pixels.
        mean = jnp.sum(acc * interior, axis=-1, keepdims=True) * inv_n
        diff = (acc - mean) * interior
        var = jnp.sum(diff * diff, axis=-1, keepdims=True) * inv_n
        y = (acc - mean) * jax.lax.rsqrt(var + EPS)
        if relu:
            y = jnp.maximum(y, 0.0)
        return y

    def reflect_fix(p):
        # Rebuild the 1-pixel reflect border from interior values, entirely
        # with lane shifts (columns first, then rows, so corners come out
        # right — identical to separable reflect padding).
        p = jnp.where(col == 0, shift(p, 2), p)
        p = jnp.where(col == Wp - 1, shift(p, -2), p)
        p = jnp.where(row == 0, shift(p, 2 * Wp), p)
        p = jnp.where(row == Hp - 1, shift(p, -2 * Wp), p)
        return p

    xp = xp_ref[0].astype(jnp.float32)                  # (C, L) padded input
    h = conv_instnorm(xp, w1_ref, relu=True)            # ConvBlock 1
    h = reflect_fix(h)                                  # in-kernel reflect pad
    y = conv_instnorm(h, w2_ref, relu=False)            # ConvBlock 2
    o_ref[0] = (xp + y).astype(o_ref.dtype)             # residual add


def residual_block(x, params):
    """ResidualBlock.forward: x + ConvBlock2(ConvBlock1(x)); NCHW input."""
    w1, b1, w2, b2 = params
    del b1, b2  # biases cancel exactly under InstanceNorm(affine=False)
    N, C, H, W = x.shape
    Hp, Wp = H + 2, W + 2
    L = Hp * Wp

    # Reflect-pad x once in XLA and flatten spatial dims -> lane-dense layout.
    xp = jnp.pad(x, ((0, 0), (0, 0), (1, 1), (1, 1)), mode="reflect")
    xp = xp.reshape(N, C, L)

    # Weights as VMEM tiles, tap-major: [dy*3+dx, co, ci].
    w1t = jnp.transpose(w1, (2, 3, 0, 1)).reshape(9, C, C).astype(jnp.float32)
    w2t = jnp.transpose(w2, (2, 3, 0, 1)).reshape(9, C, C).astype(jnp.float32)

    # Static row/col index of every padded-flat position (avoids in-kernel
    # integer div/mod).
    pos = np.arange(L, dtype=np.int32)
    row_ids = jnp.asarray((pos // Wp).reshape(1, L))
    col_ids = jnp.asarray((pos % Wp).reshape(1, L))

    kernel = functools.partial(_resblock_kernel, C=C, H=H, W=W)
    out_flat = pl.pallas_call(
        kernel,
        out_shape=jax.ShapeDtypeStruct((N, C, L), x.dtype),
        grid=(N,),
        in_specs=[
            pl.BlockSpec((1, C, L), lambda n: (n, 0, 0)),
            pl.BlockSpec((9, C, C), lambda n: (0, 0, 0)),
            pl.BlockSpec((9, C, C), lambda n: (0, 0, 0)),
            pl.BlockSpec((1, L), lambda n: (0, 0)),
            pl.BlockSpec((1, L), lambda n: (0, 0)),
        ],
        out_specs=pl.BlockSpec((1, C, L), lambda n: (n, 0, 0)),
        compiler_params=pltpu.CompilerParams(
            dimension_semantics=("parallel",)),
    )(xp, w1t, w2t, row_ids, col_ids)

    # Crop the 1-pixel border (garbage) -> back to NCHW.
    return out_flat.reshape(N, C, Hp, Wp)[:, :, 1:H + 1, 1:W + 1]


# ---------------------------------------------------------------------------
# Pure-JAX reference (for correctness check only)
# ---------------------------------------------------------------------------
def _conv_block_ref(x, w, b, use_act):
    xp = jnp.pad(x, ((0, 0), (0, 0), (1, 1), (1, 1)), mode="reflect")
    y = jax.lax.conv_general_dilated(
        xp, w, window_strides=(1, 1), padding="VALID",
        dimension_numbers=("NCHW", "OIHW", "NCHW"),
        precision=jax.lax.Precision.HIGHEST)
    y = y + b[None, :, None, None]
    mean = jnp.mean(y, axis=(2, 3), keepdims=True)
    var = jnp.mean((y - mean) ** 2, axis=(2, 3), keepdims=True)
    y = (y - mean) * jax.lax.rsqrt(var + EPS)
    if use_act:
        y = jnp.maximum(y, 0.0)
    return y


def _residual_block_ref(x, params):
    w1, b1, w2, b2 = params
    h = _conv_block_ref(x, w1, b1, True)
    return x + _conv_block_ref(h, w2, b2, False)


# ---------------------------------------------------------------------------
def init_params(key, channels):
    """Deterministic Conv2d-style init (uniform(-1/sqrt(fan_in), +1/sqrt(fan_in)))."""
    fan_in = channels * 3 * 3
    bound = 1.0 / np.sqrt(fan_in)
    k1, k2, k3, k4 = jax.random.split(key, 4)
    w1 = jax.random.uniform(k1, (channels, channels, 3, 3), jnp.float32,
                            -bound, bound)
    b1 = jax.random.uniform(k2, (channels,), jnp.float32, -bound, bound)
    w2 = jax.random.uniform(k3, (channels, channels, 3, 3), jnp.float32,
                            -bound, bound)
    b2 = jax.random.uniform(k4, (channels,), jnp.float32, -bound, bound)
    return w1, b1, w2, b2


if __name__ == "__main__":
    key = jax.random.PRNGKey(0)
    kx, kp = jax.random.split(key)

    N, C, H, W = 2, 4, 16, 16
    x = jax.random.normal(kx, (N, C, H, W), dtype=jnp.float32)
    params = init_params(kp, C)

    out = jax.block_until_ready(residual_block(x, params))
    ref = jax.block_until_ready(_residual_block_ref(x, params))
    np.testing.assert_allclose(np.asarray(out), np.asarray(ref),
                               rtol=1e-4, atol=1e-4)

    print("KERNEL_OK")
</pallas_src>

<mosaic_0001>
module attributes {stable_mosaic.version = 11 : i64} {
  func.func @_resblock_kernel(%arg0: i32, %arg1: memref<1x4x324xf32, #tpu.memory_space<vmem>>, %arg2: memref<9x4x4xf32, #tpu.memory_space<vmem>>, %arg3: memref<9x4x4xf32, #tpu.memory_space<vmem>>, %arg4: memref<1x324xi32, #tpu.memory_space<vmem>>, %arg5: memref<1x324xi32, #tpu.memory_space<vmem>>, %arg6: memref<1x4x324xf32, #tpu.memory_space<vmem>>) attributes {dimension_semantics = [#tpu.dimension_semantics<parallel>], iteration_bounds = array<i64: 2>, scalar_prefetch = 0 : i64, scratch_operands = 0 : i64, tpu.core_type = #tpu.core_type<tc>, window_params = [{transform_indices = @transform_0, window_bounds = array<i64: 1, 4, 324>}, {pipeline_mode = #tpu.pipeline_mode<synchronous>, transform_indices = @transform_1, window_bounds = array<i64: 9, 4, 4>}, {pipeline_mode = #tpu.pipeline_mode<synchronous>, transform_indices = @transform_2, window_bounds = array<i64: 9, 4, 4>}, {pipeline_mode = #tpu.pipeline_mode<synchronous>, transform_indices = @transform_3, window_bounds = array<i64: 1, 324>}, {pipeline_mode = #tpu.pipeline_mode<synchronous>, transform_indices = @transform_4, window_bounds = array<i64: 1, 324>}, {transform_indices = @transform_5, window_bounds = array<i64: 1, 4, 324>}]} {
    %c0 = arith.constant 0 : index
    %c0_0 = arith.constant 0 : index
    %0 = vector.load %arg4[%c0, %c0_0] : memref<1x324xi32, #tpu.memory_space<vmem>>, vector<1x324xi32>
    %c0_1 = arith.constant 0 : index
    %c0_2 = arith.constant 0 : index
    %1 = vector.load %arg5[%c0_1, %c0_2] : memref<1x324xi32, #tpu.memory_space<vmem>>, vector<1x324xi32>
    %c1_i32 = arith.constant 1 : i32
    %2 = vector.broadcast %c1_i32 : i32 to vector<1x324xi32>
    %3 = arith.cmpi sge, %0, %2 : vector<1x324xi32>
    %c16_i32 = arith.constant 16 : i32
    %4 = vector.broadcast %c16_i32 : i32 to vector<1x324xi32>
    %5 = arith.cmpi sle, %0, %4 : vector<1x324xi32>
    %6 = arith.andi %3, %5 : vector<1x324xi1>
    %c1_i32_3 = arith.constant 1 : i32
    %7 = vector.broadcast %c1_i32_3 : i32 to vector<1x324xi32>
    %8 = arith.cmpi sge, %1, %7 : vector<1x324xi32>
    %9 = arith.andi %6, %8 : vector<1x324xi1>
    %c16_i32_4 = arith.constant 16 : i32
    %10 = vector.broadcast %c16_i32_4 : i32 to vector<1x324xi32>
    %11 = arith.cmpi sle, %1, %10 : vector<1x324xi32>
    %12 = arith.andi %9, %11 : vector<1x324xi1>
    %13 = arith.extui %12 : vector<1x324xi1> to vector<1x324xi32>
    %14 = arith.sitofp %13 : vector<1x324xi32> to vector<1x324xf32>
    %c0_5 = arith.constant 0 : index
    %c0_6 = arith.constant 0 : index
    %c0_7 = arith.constant 0 : index
    %15 = vector.load %arg1[%c0_5, %c0_6, %c0_7] : memref<1x4x324xf32, #tpu.memory_space<vmem>>, vector<1x4x324xf32>
    %16 = vector.shape_cast %15 : vector<1x4x324xf32> to vector<4x324xf32>
    %c0_8 = arith.constant 0 : index
    %c0_9 = arith.constant 0 : index
    %c0_10 = arith.constant 0 : index
    %17 = vector.load %arg2[%c0_8, %c0_9, %c0_10] : memref<9x4x4xf32, #tpu.memory_space<vmem>>, vector<1x4x4xf32>
    %18 = vector.shape_cast %17 : vector<1x4x4xf32> to vector<4x4xf32>
    %19 = vector.extract_strided_slice %16 {offsets = [0, 305], sizes = [4, 19], strides = [1, 1]} : vector<4x324xf32> to vector<4x19xf32>
    %20 = vector.extract_strided_slice %16 {offsets = [0, 0], sizes = [4, 305], strides = [1, 1]} : vector<4x324xf32> to vector<4x305xf32>
    %21 = tpu.concatenate %19, %20 in 1 : vector<4x19xf32>, vector<4x305xf32> -> vector<4x324xf32>
    %cst = arith.constant dense<0.000000e+00> : vector<4x324xf32>
    %22 = tpu.matmul %18, %21, %cst {dimension_numbers = #tpu.dot_dimension_numbers<[1], [0], [0], [1], [0, 0, 1, 1], [], []>} : vector<4x4xf32>, vector<4x324xf32>, vector<4x324xf32> -> vector<4x324xf32>
    %c1 = arith.constant 1 : index
    %c0_11 = arith.constant 0 : index
    %c0_12 = arith.constant 0 : index
    %23 = vector.load %arg2[%c1, %c0_11, %c0_12] : memref<9x4x4xf32, #tpu.memory_space<vmem>>, vector<1x4x4xf32>
    %24 = vector.shape_cast %23 : vector<1x4x4xf32> to vector<4x4xf32>
    %25 = vector.extract_strided_slice %16 {offsets = [0, 306], sizes = [4, 18], strides = [1, 1]} : vector<4x324xf32> to vector<4x18xf32>
    %26 = vector.extract_strided_slice %16 {offsets = [0, 0], sizes = [4, 306], strides = [1, 1]} : vector<4x324xf32> to vector<4x306xf32>
    %27 = tpu.concatenate %25, %26 in 1 : vector<4x18xf32>, vector<4x306xf32> -> vector<4x324xf32>
    %cst_13 = arith.constant dense<0.000000e+00> : vector<4x324xf32>
    %28 = tpu.matmul %24, %27, %cst_13 {dimension_numbers = #tpu.dot_dimension_numbers<[1], [0], [0], [1], [0, 0, 1, 1], [], []>} : vector<4x4xf32>, vector<4x324xf32>, vector<4x324xf32> -> vector<4x324xf32>
    %29 = arith.addf %22, %28 : vector<4x324xf32>
    %c2 = arith.constant 2 : index
    %c0_14 = arith.constant 0 : index
    %c0_15 = arith.constant 0 : index
    %30 = vector.load %arg2[%c2, %c0_14, %c0_15] : memref<9x4x4xf32, #tpu.memory_space<vmem>>, vector<1x4x4xf32>
    %31 = vector.shape_cast %30 : vector<1x4x4xf32> to vector<4x4xf32>
    %32 = vector.extract_strided_slice %16 {offsets = [0, 307], sizes = [4, 17], strides = [1, 1]} : vector<4x324xf32> to vector<4x17xf32>
    %33 = vector.extract_strided_slice %16 {offsets = [0, 0], sizes = [4, 307], strides = [1, 1]} : vector<4x324xf32> to vector<4x307xf32>
    %34 = tpu.concatenate %32, %33 in 1 : vector<4x17xf32>, vector<4x307xf32> -> vector<4x324xf32>
    %cst_16 = arith.constant dense<0.000000e+00> : vector<4x324xf32>
    %35 = tpu.matmul %31, %34, %cst_16 {dimension_numbers = #tpu.dot_dimension_numbers<[1], [0], [0], [1], [0, 0, 1, 1], [], []>} : vector<4x4xf32>, vector<4x324xf32>, vector<4x324xf32> -> vector<4x324xf32>
    %36 = arith.addf %29, %35 : vector<4x324xf32>
    %c3 = arith.constant 3 : index
    %c0_17 = arith.constant 0 : index
    %c0_18 = arith.constant 0 : index
    %37 = vector.load %arg2[%c3, %c0_17, %c0_18] : memref<9x4x4xf32, #tpu.memory_space<vmem>>, vector<1x4x4xf32>
    %38 = vector.shape_cast %37 : vector<1x4x4xf32> to vector<4x4xf32>
    %39 = vector.extract_strided_slice %16 {offsets = [0, 323], sizes = [4, 1], strides = [1, 1]} : vector<4x324xf32> to vector<4x1xf32>
    %40 = vector.extract_strided_slice %16 {offsets = [0, 0], sizes = [4, 323], strides = [1, 1]} : vector<4x324xf32> to vector<4x323xf32>
    %41 = tpu.concatenate %39, %40 in 1 : vector<4x1xf32>, vector<4x323xf32> -> vector<4x324xf32>
    %cst_19 = arith.constant dense<0.000000e+00> : vector<4x324xf32>
    %42 = tpu.matmul %38, %41, %cst_19 {dimension_numbers = #tpu.dot_dimension_numbers<[1], [0], [0], [1], [0, 0, 1, 1], [], []>} : vector<4x4xf32>, vector<4x324xf32>, vector<4x324xf32> -> vector<4x324xf32>
    %43 = arith.addf %36, %42 : vector<4x324xf32>
    %c4 = arith.constant 4 : index
    %c0_20 = arith.constant 0 : index
    %c0_21 = arith.constant 0 : index
    %44 = vector.load %arg2[%c4, %c0_20, %c0_21] : memref<9x4x4xf32, #tpu.memory_space<vmem>>, vector<1x4x4xf32>
    %45 = vector.shape_cast %44 : vector<1x4x4xf32> to vector<4x4xf32>
    %cst_22 = arith.constant dense<0.000000e+00> : vector<4x324xf32>
    %46 = tpu.matmul %45, %16, %cst_22 {dimension_numbers = #tpu.dot_dimension_numbers<[1], [0], [0], [1], [0, 0, 1, 1], [], []>} : vector<4x4xf32>, vector<4x324xf32>, vector<4x324xf32> -> vector<4x324xf32>
    %47 = arith.addf %43, %46 : vector<4x324xf32>
    %c5 = arith.constant 5 : index
    %c0_23 = arith.constant 0 : index
    %c0_24 = arith.constant 0 : index
    %48 = vector.load %arg2[%c5, %c0_23, %c0_24] : memref<9x4x4xf32, #tpu.memory_space<vmem>>, vector<1x4x4xf32>
    %49 = vector.shape_cast %48 : vector<1x4x4xf32> to vector<4x4xf32>
    %50 = vector.extract_strided_slice %16 {offsets = [0, 1], sizes = [4, 323], strides = [1, 1]} : vector<4x324xf32> to vector<4x323xf32>
    %51 = vector.extract_strided_slice %16 {offsets = [0, 0], sizes = [4, 1], strides = [1, 1]} : vector<4x324xf32> to vector<4x1xf32>
    %52 = tpu.concatenate %50, %51 in 1 : vector<4x323xf32>, vector<4x1xf32> -> vector<4x324xf32>
    %cst_25 = arith.constant dense<0.000000e+00> : vector<4x324xf32>
    %53 = tpu.matmul %49, %52, %cst_25 {dimension_numbers = #tpu.dot_dimension_numbers<[1], [0], [0], [1], [0, 0, 1, 1], [], []>} : vector<4x4xf32>, vector<4x324xf32>, vector<4x324xf32> -> vector<4x324xf32>
    %54 = arith.addf %47, %53 : vector<4x324xf32>
    %c6 = arith.constant 6 : index
    %c0_26 = arith.constant 0 : index
    %c0_27 = arith.constant 0 : index
    %55 = vector.load %arg2[%c6, %c0_26, %c0_27] : memref<9x4x4xf32, #tpu.memory_space<vmem>>, vector<1x4x4xf32>
    %56 = vector.shape_cast %55 : vector<1x4x4xf32> to vector<4x4xf32>
    %57 = vector.extract_strided_slice %16 {offsets = [0, 17], sizes = [4, 307], strides = [1, 1]} : vector<4x324xf32> to vector<4x307xf32>
    %58 = vector.extract_strided_slice %16 {offsets = [0, 0], sizes = [4, 17], strides = [1, 1]} : vector<4x324xf32> to vector<4x17xf32>
    %59 = tpu.concatenate %57, %58 in 1 : vector<4x307xf32>, vector<4x17xf32> -> vector<4x324xf32>
    %cst_28 = arith.constant dense<0.000000e+00> : vector<4x324xf32>
    %60 = tpu.matmul %56, %59, %cst_28 {dimension_numbers = #tpu.dot_dimension_numbers<[1], [0], [0], [1], [0, 0, 1, 1], [], []>} : vector<4x4xf32>, vector<4x324xf32>, vector<4x324xf32> -> vector<4x324xf32>
    %61 = arith.addf %54, %60 : vector<4x324xf32>
    %c7 = arith.constant 7 : index
    %c0_29 = arith.constant 0 : index
    %c0_30 = arith.constant 0 : index
    %62 = vector.load %arg2[%c7, %c0_29, %c0_30] : memref<9x4x4xf32, #tpu.memory_space<vmem>>, vector<1x4x4xf32>
    %63 = vector.shape_cast %62 : vector<1x4x4xf32> to vector<4x4xf32>
    %64 = vector.extract_strided_slice %16 {offsets = [0, 18], sizes = [4, 306], strides = [1, 1]} : vector<4x324xf32> to vector<4x306xf32>
    %65 = vector.extract_strided_slice %16 {offsets = [0, 0], sizes = [4, 18], strides = [1, 1]} : vector<4x324xf32> to vector<4x18xf32>
    %66 = tpu.concatenate %64, %65 in 1 : vector<4x306xf32>, vector<4x18xf32> -> vector<4x324xf32>
    %cst_31 = arith.constant dense<0.000000e+00> : vector<4x324xf32>
    %67 = tpu.matmul %63, %66, %cst_31 {dimension_numbers = #tpu.dot_dimension_numbers<[1], [0], [0], [1], [0, 0, 1, 1], [], []>} : vector<4x4xf32>, vector<4x324xf32>, vector<4x324xf32> -> vector<4x324xf32>
    %68 = arith.addf %61, %67 : vector<4x324xf32>
    %c8 = arith.constant 8 : index
    %c0_32 = arith.constant 0 : index
    %c0_33 = arith.constant 0 : index
    %69 = vector.load %arg2[%c8, %c0_32, %c0_33] : memref<9x4x4xf32, #tpu.memory_space<vmem>>, vector<1x4x4xf32>
    %70 = vector.shape_cast %69 : vector<1x4x4xf32> to vector<4x4xf32>
    %71 = vector.extract_strided_slice %16 {offsets = [0, 19], sizes = [4, 305], strides = [1, 1]} : vector<4x324xf32> to vector<4x305xf32>
    %72 = vector.extract_strided_slice %16 {offsets = [0, 0], sizes = [4, 19], strides = [1, 1]} : vector<4x324xf32> to vector<4x19xf32>
    %73 = tpu.concatenate %71, %72 in 1 : vector<4x305xf32>, vector<4x19xf32> -> vector<4x324xf32>
    %cst_34 = arith.constant dense<0.000000e+00> : vector<4x324xf32>
    %74 = tpu.matmul %70, %73, %cst_34 {dimension_numbers = #tpu.dot_dimension_numbers<[1], [0], [0], [1], [0, 0, 1, 1], [], []>} : vector<4x4xf32>, vector<4x324xf32>, vector<4x324xf32> -> vector<4x324xf32>
    %75 = arith.addf %68, %74 : vector<4x324xf32>
    %76 = vector.broadcast %14 : vector<1x324xf32> to vector<4x324xf32>
    %77 = arith.mulf %75, %76 : vector<4x324xf32>
    %cst_35 = arith.constant dense<0.000000e+00> : vector<4xf32>
    %78 = vector.multi_reduction <add>, %77, %cst_35 [1] : vector<4x324xf32> to vector<4xf32>
    %79 = vector.shape_cast %78 : vector<4xf32> to vector<4x1xf32>
    %cst_36 = arith.constant 3.906250e-03 : f32
    %80 = vector.broadcast %cst_36 : f32 to vector<4x1xf32>
    %81 = arith.mulf %79, %80 : vector<4x1xf32>
    %82 = vector.broadcast %81 : vector<4x1xf32> to vector<4x324xf32>
    %83 = arith.subf %75, %82 : vector<4x324xf32>
    %84 = vector.broadcast %14 : vector<1x324xf32> to vector<4x324xf32>
    %85 = arith.mulf %83, %84 : vector<4x324xf32>
    %86 = arith.mulf %85, %85 : vector<4x324xf32>
    %cst_37 = arith.constant dense<0.000000e+00> : vector<4xf32>
    %87 = vector.multi_reduction <add>, %86, %cst_37 [1] : vector<4x324xf32> to vector<4xf32>
    %88 = vector.shape_cast %87 : vector<4xf32> to vector<4x1xf32>
    %cst_38 = arith.constant 3.906250e-03 : f32
    %89 = vector.broadcast %cst_38 : f32 to vector<4x1xf32>
    %90 = arith.mulf %88, %89 : vector<4x1xf32>
    %91 = vector.broadcast %81 : vector<4x1xf32> to vector<4x324xf32>
    %92 = arith.subf %75, %91 : vector<4x324xf32>
    %cst_39 = arith.constant 9.99999974E-6 : f32
    %93 = vector.broadcast %cst_39 : f32 to vector<4x1xf32>
    %94 = arith.addf %90, %93 : vector<4x1xf32>
    %95 = math.rsqrt %94 : vector<4x1xf32>
    %96 = vector.broadcast %95 : vector<4x1xf32> to vector<4x324xf32>
    %97 = arith.mulf %92, %96 : vector<4x324xf32>
    %cst_40 = arith.constant 0.000000e+00 : f32
    %98 = vector.broadcast %cst_40 : f32 to vector<4x324xf32>
    %99 = arith.maximumf %97, %98 : vector<4x324xf32>
    %c0_i32 = arith.constant 0 : i32
    %100 = vector.broadcast %c0_i32 : i32 to vector<1x324xi32>
    %101 = arith.cmpi eq, %1, %100 : vector<1x324xi32>
    %102 = vector.extract_strided_slice %99 {offsets = [0, 2], sizes = [4, 322], strides = [1, 1]} : vector<4x324xf32> to vector<4x322xf32>
    %103 = vector.extract_strided_slice %99 {offsets = [0, 0], sizes = [4, 2], strides = [1, 1]} : vector<4x324xf32> to vector<4x2xf32>
    %104 = tpu.concatenate %102, %103 in 1 : vector<4x322xf32>, vector<4x2xf32> -> vector<4x324xf32>
    %105 = vector.shape_cast %101 : vector<1x324xi1> to vector<1x324xi1>
    %106 = vector.broadcast %105 : vector<1x324xi1> to vector<4x324xi1>
    %107 = arith.select %106, %104, %99 : vector<4x324xi1>, vector<4x324xf32>
    %c17_i32 = arith.constant 17 : i32
    %108 = vector.broadcast %c17_i32 : i32 to vector<1x324xi32>
    %109 = arith.cmpi eq, %1, %108 : vector<1x324xi32>
    %110 = vector.extract_strided_slice %107 {offsets = [0, 322], sizes = [4, 2], strides = [1, 1]} : vector<4x324xf32> to vector<4x2xf32>
    %111 = vector.extract_strided_slice %107 {offsets = [0, 0], sizes = [4, 322], strides = [1, 1]} : vector<4x324xf32> to vector<4x322xf32>
    %112 = tpu.concatenate %110, %111 in 1 : vector<4x2xf32>, vector<4x322xf32> -> vector<4x324xf32>
    %113 = vector.shape_cast %109 : vector<1x324xi1> to vector<1x324xi1>
    %114 = vector.broadcast %113 : vector<1x324xi1> to vector<4x324xi1>
    %115 = arith.select %114, %112, %107 : vector<4x324xi1>, vector<4x324xf32>
    %c0_i32_41 = arith.constant 0 : i32
    %116 = vector.broadcast %c0_i32_41 : i32 to vector<1x324xi32>
    %117 = arith.cmpi eq, %0, %116 : vector<1x324xi32>
    %118 = vector.extract_strided_slice %115 {offsets = [0, 36], sizes = [4, 288], strides = [1, 1]} : vector<4x324xf32> to vector<4x288xf32>
    %119 = vector.extract_strided_slice %115 {offsets = [0, 0], sizes = [4, 36], strides = [1, 1]} : vector<4x324xf32> to vector<4x36xf32>
    %120 = tpu.concatenate %118, %119 in 1 : vector<4x288xf32>, vector<4x36xf32> -> vector<4x324xf32>
    %121 = vector.shape_cast %117 : vector<1x324xi1> to vector<1x324xi1>
    %122 = vector.broadcast %121 : vector<1x324xi1> to vector<4x324xi1>
    %123 = arith.select %122, %120, %115 : vector<4x324xi1>, vector<4x324xf32>
    %c17_i32_42 = arith.constant 17 : i32
    %124 = vector.broadcast %c17_i32_42 : i32 to vector<1x324xi32>
    %125 = arith.cmpi eq, %0, %124 : vector<1x324xi32>
    %126 = vector.extract_strided_slice %123 {offsets = [0, 288], sizes = [4, 36], strides = [1, 1]} : vector<4x324xf32> to vector<4x36xf32>
    %127 = vector.extract_strided_slice %123 {offsets = [0, 0], sizes = [4, 288], strides = [1, 1]} : vector<4x324xf32> to vector<4x288xf32>
    %128 = tpu.concatenate %126, %127 in 1 : vector<4x36xf32>, vector<4x288xf32> -> vector<4x324xf32>
    %129 = vector.shape_cast %125 : vector<1x324xi1> to vector<1x324xi1>
    %130 = vector.broadcast %129 : vector<1x324xi1> to vector<4x324xi1>
    %131 = arith.select %130, %128, %123 : vector<4x324xi1>, vector<4x324xf32>
    %c0_43 = arith.constant 0 : index
    %c0_44 = arith.constant 0 : index
    %c0_45 = arith.constant 0 : index
    %132 = vector.load %arg3[%c0_43, %c0_44, %c0_45] : memref<9x4x4xf32, #tpu.memory_space<vmem>>, vector<1x4x4xf32>
    %133 = vector.shape_cast %132 : vector<1x4x4xf32> to vector<4x4xf32>
    %134 = vector.extract_strided_slice %131 {offsets = [0, 305], sizes = [4, 19], strides = [1, 1]} : vector<4x324xf32> to vector<4x19xf32>
    %135 = vector.extract_strided_slice %131 {offsets = [0, 0], sizes = [4, 305], strides = [1, 1]} : vector<4x324xf32> to vector<4x305xf32>
    %136 = tpu.concatenate %134, %135 in 1 : vector<4x19xf32>, vector<4x305xf32> -> vector<4x324xf32>
    %cst_46 = arith.constant dense<0.000000e+00> : vector<4x324xf32>
    %137 = tpu.matmul %133, %136, %cst_46 {dimension_numbers = #tpu.dot_dimension_numbers<[1], [0], [0], [1], [0, 0, 1, 1], [], []>} : vector<4x4xf32>, vector<4x324xf32>, vector<4x324xf32> -> vector<4x324xf32>
    %c1_47 = arith.constant 1 : index
    %c0_48 = arith.constant 0 : index
    %c0_49 = arith.constant 0 : index
    %138 = vector.load %arg3[%c1_47, %c0_48, %c0_49] : memref<9x4x4xf32, #tpu.memory_space<vmem>>, vector<1x4x4xf32>
    %139 = vector.shape_cast %138 : vector<1x4x4xf32> to vector<4x4xf32>
    %140 = vector.extract_strided_slice %131 {offsets = [0, 306], sizes = [4, 18], strides = [1, 1]} : vector<4x324xf32> to vector<4x18xf32>
    %141 = vector.extract_strided_slice %131 {offsets = [0, 0], sizes = [4, 306], strides = [1, 1]} : vector<4x324xf32> to vector<4x306xf32>
    %142 = tpu.concatenate %140, %141 in 1 : vector<4x18xf32>, vector<4x306xf32> -> vector<4x324xf32>
    %cst_50 = arith.constant dense<0.000000e+00> : vector<4x324xf32>
    %143 = tpu.matmul %139, %142, %cst_50 {dimension_numbers = #tpu.dot_dimension_numbers<[1], [0], [0], [1], [0, 0, 1, 1], [], []>} : vector<4x4xf32>, vector<4x324xf32>, vector<4x324xf32> -> vector<4x324xf32>
    %144 = arith.addf %137, %143 : vector<4x324xf32>
    %c2_51 = arith.constant 2 : index
    %c0_52 = arith.constant 0 : index
    %c0_53 = arith.constant 0 : index
    %145 = vector.load %arg3[%c2_51, %c0_52, %c0_53] : memref<9x4x4xf32, #tpu.memory_space<vmem>>, vector<1x4x4xf32>
    %146 = vector.shape_cast %145 : vector<1x4x4xf32> to vector<4x4xf32>
    %147 = vector.extract_strided_slice %131 {offsets = [0, 307], sizes = [4, 17], strides = [1, 1]} : vector<4x324xf32> to vector<4x17xf32>
    %148 = vector.extract_strided_slice %131 {offsets = [0, 0], sizes = [4, 307], strides = [1, 1]} : vector<4x324xf32> to vector<4x307xf32>
    %149 = tpu.concatenate %147, %148 in 1 : vector<4x17xf32>, vector<4x307xf32> -> vector<4x324xf32>
    %cst_54 = arith.constant dense<0.000000e+00> : vector<4x324xf32>
    %150 = tpu.matmul %146, %149, %cst_54 {dimension_numbers = #tpu.dot_dimension_numbers<[1], [0], [0], [1], [0, 0, 1, 1], [], []>} : vector<4x4xf32>, vector<4x324xf32>, vector<4x324xf32> -> vector<4x324xf32>
    %151 = arith.addf %144, %150 : vector<4x324xf32>
    %c3_55 = arith.constant 3 : index
    %c0_56 = arith.constant 0 : index
    %c0_57 = arith.constant 0 : index
    %152 = vector.load %arg3[%c3_55, %c0_56, %c0_57] : memref<9x4x4xf32, #tpu.memory_space<vmem>>, vector<1x4x4xf32>
    %153 = vector.shape_cast %152 : vector<1x4x4xf32> to vector<4x4xf32>
    %154 = vector.extract_strided_slice %131 {offsets = [0, 323], sizes = [4, 1], strides = [1, 1]} : vector<4x324xf32> to vector<4x1xf32>
    %155 = vector.extract_strided_slice %131 {offsets = [0, 0], sizes = [4, 323], strides = [1, 1]} : vector<4x324xf32> to vector<4x323xf32>
    %156 = tpu.concatenate %154, %155 in 1 : vector<4x1xf32>, vector<4x323xf32> -> vector<4x324xf32>
    %cst_58 = arith.constant dense<0.000000e+00> : vector<4x324xf32>
    %157 = tpu.matmul %153, %156, %cst_58 {dimension_numbers = #tpu.dot_dimension_numbers<[1], [0], [0], [1], [0, 0, 1, 1], [], []>} : vector<4x4xf32>, vector<4x324xf32>, vector<4x324xf32> -> vector<4x324xf32>
    %158 = arith.addf %151, %157 : vector<4x324xf32>
    %c4_59 = arith.constant 4 : index
    %c0_60 = arith.constant 0 : index
    %c0_61 = arith.constant 0 : index
    %159 = vector.load %arg3[%c4_59, %c0_60, %c0_61] : memref<9x4x4xf32, #tpu.memory_space<vmem>>, vector<1x4x4xf32>
    %160 = vector.shape_cast %159 : vector<1x4x4xf32> to vector<4x4xf32>
    %cst_62 = arith.constant dense<0.000000e+00> : vector<4x324xf32>
    %161 = tpu.matmul %160, %131, %cst_62 {dimension_numbers = #tpu.dot_dimension_numbers<[1], [0], [0], [1], [0, 0, 1, 1], [], []>} : vector<4x4xf32>, vector<4x324xf32>, vector<4x324xf32> -> vector<4x324xf32>
    %162 = arith.addf %158, %161 : vector<4x324xf32>
    %c5_63 = arith.constant 5 : index
    %c0_64 = arith.constant 0 : index
    %c0_65 = arith.constant 0 : index
    %163 = vector.load %arg3[%c5_63, %c0_64, %c0_65] : memref<9x4x4xf32, #tpu.memory_space<vmem>>, vector<1x4x4xf32>
    %164 = vector.shape_cast %163 : vector<1x4x4xf32> to vector<4x4xf32>
    %165 = vector.extract_strided_slice %131 {offsets = [0, 1], sizes = [4, 323], strides = [1, 1]} : vector<4x324xf32> to vector<4x323xf32>
    %166 = vector.extract_strided_slice %131 {offsets = [0, 0], sizes = [4, 1], strides = [1, 1]} : vector<4x324xf32> to vector<4x1xf32>
    %167 = tpu.concatenate %165, %166 in 1 : vector<4x323xf32>, vector<4x1xf32> -> vector<4x324xf32>
    %cst_66 = arith.constant dense<0.000000e+00> : vector<4x324xf32>
    %168 = tpu.matmul %164, %167, %cst_66 {dimension_numbers = #tpu.dot_dimension_numbers<[1], [0], [0], [1], [0, 0, 1, 1], [], []>} : vector<4x4xf32>, vector<4x324xf32>, vector<4x324xf32> -> vector<4x324xf32>
    %169 = arith.addf %162, %168 : vector<4x324xf32>
    %c6_67 = arith.constant 6 : index
    %c0_68 = arith.constant 0 : index
    %c0_69 = arith.constant 0 : index
    %170 = vector.load %arg3[%c6_67, %c0_68, %c0_69] : memref<9x4x4xf32, #tpu.memory_space<vmem>>, vector<1x4x4xf32>
    %171 = vector.shape_cast %170 : vector<1x4x4xf32> to vector<4x4xf32>
    %172 = vector.extract_strided_slice %131 {offsets = [0, 17], sizes = [4, 307], strides = [1, 1]} : vector<4x324xf32> to vector<4x307xf32>
    %173 = vector.extract_strided_slice %131 {offsets = [0, 0], sizes = [4, 17], strides = [1, 1]} : vector<4x324xf32> to vector<4x17xf32>
    %174 = tpu.concatenate %172, %173 in 1 : vector<4x307xf32>, vector<4x17xf32> -> vector<4x324xf32>
    %cst_70 = arith.constant dense<0.000000e+00> : vector<4x324xf32>
    %175 = tpu.matmul %171, %174, %cst_70 {dimension_numbers = #tpu.dot_dimension_numbers<[1], [0], [0], [1], [0, 0, 1, 1], [], []>} : vector<4x4xf32>, vector<4x324xf32>, vector<4x324xf32> -> vector<4x324xf32>
    %176 = arith.addf %169, %175 : vector<4x324xf32>
    %c7_71 = arith.constant 7 : index
    %c0_72 = arith.constant 0 : index
    %c0_73 = arith.constant 0 : index
    %177 = vector.load %arg3[%c7_71, %c0_72, %c0_73] : memref<9x4x4xf32, #tpu.memory_space<vmem>>, vector<1x4x4xf32>
    %178 = vector.shape_cast %177 : vector<1x4x4xf32> to vector<4x4xf32>
    %179 = vector.extract_strided_slice %131 {offsets = [0, 18], sizes = [4, 306], strides = [1, 1]} : vector<4x324xf32> to vector<4x306xf32>
    %180 = vector.extract_strided_slice %131 {offsets = [0, 0], sizes = [4, 18], strides = [1, 1]} : vector<4x324xf32> to vector<4x18xf32>
    %181 = tpu.concatenate %179, %180 in 1 : vector<4x306xf32>, vector<4x18xf32> -> vector<4x324xf32>
    %cst_74 = arith.constant dense<0.000000e+00> : vector<4x324xf32>
    %182 = tpu.matmul %178, %181, %cst_74 {dimension_numbers = #tpu.dot_dimension_numbers<[1], [0], [0], [1], [0, 0, 1, 1], [], []>} : vector<4x4xf32>, vector<4x324xf32>, vector<4x324xf32> -> vector<4x324xf32>
    %183 = arith.addf %176, %182 : vector<4x324xf32>
    %c8_75 = arith.constant 8 : index
    %c0_76 = arith.constant 0 : index
    %c0_77 = arith.constant 0 : index
    %184 = vector.load %arg3[%c8_75, %c0_76, %c0_77] : memref<9x4x4xf32, #tpu.memory_space<vmem>>, vector<1x4x4xf32>
    %185 = vector.shape_cast %184 : vector<1x4x4xf32> to vector<4x4xf32>
    %186 = vector.extract_strided_slice %131 {offsets = [0, 19], sizes = [4, 305], strides = [1, 1]} : vector<4x324xf32> to vector<4x305xf32>
    %187 = vector.extract_strided_slice %131 {offsets = [0, 0], sizes = [4, 19], strides = [1, 1]} : vector<4x324xf32> to vector<4x19xf32>
    %188 = tpu.concatenate %186, %187 in 1 : vector<4x305xf32>, vector<4x19xf32> -> vector<4x324xf32>
    %cst_78 = arith.constant dense<0.000000e+00> : vector<4x324xf32>
    %189 = tpu.matmul %185, %188, %cst_78 {dimension_numbers = #tpu.dot_dimension_numbers<[1], [0], [0], [1], [0, 0, 1, 1], [], []>} : vector<4x4xf32>, vector<4x324xf32>, vector<4x324xf32> -> vector<4x324xf32>
    %190 = arith.addf %183, %189 : vector<4x324xf32>
    %191 = vector.broadcast %14 : vector<1x324xf32> to vector<4x324xf32>
    %192 = arith.mulf %190, %191 : vector<4x324xf32>
    %cst_79 = arith.constant dense<0.000000e+00> : vector<4xf32>
    %193 = vector.multi_reduction <add>, %192, %cst_79 [1] : vector<4x324xf32> to vector<4xf32>
    %194 = vector.shape_cast %193 : vector<4xf32> to vector<4x1xf32>
    %cst_80 = arith.constant 3.906250e-03 : f32
    %195 = vector.broadcast %cst_80 : f32 to vector<4x1xf32>
    %196 = arith.mulf %194, %195 : vector<4x1xf32>
    %197 = vector.broadcast %196 : vector<4x1xf32> to vector<4x324xf32>
    %198 = arith.subf %190, %197 : vector<4x324xf32>
    %199 = vector.broadcast %14 : vector<1x324xf32> to vector<4x324xf32>
    %200 = arith.mulf %198, %199 : vector<4x324xf32>
    %201 = arith.mulf %200, %200 : vector<4x324xf32>
    %cst_81 = arith.constant dense<0.000000e+00> : vector<4xf32>
    %202 = vector.multi_reduction <add>, %201, %cst_81 [1] : vector<4x324xf32> to vector<4xf32>
    %203 = vector.shape_cast %202 : vector<4xf32> to vector<4x1xf32>
    %cst_82 = arith.constant 3.906250e-03 : f32
    %204 = vector.broadcast %cst_82 : f32 to vector<4x1xf32>
    %205 = arith.mulf %203, %204 : vector<4x1xf32>
    %206 = vector.broadcast %196 : vector<4x1xf32> to vector<4x324xf32>
    %207 = arith.subf %190, %206 : vector<4x324xf32>
    %cst_83 = arith.constant 9.99999974E-6 : f32
    %208 = vector.broadcast %cst_83 : f32 to vector<4x1xf32>
    %209 = arith.addf %205, %208 : vector<4x1xf32>
    %210 = math.rsqrt %209 : vector<4x1xf32>
    %211 = vector.broadcast %210 : vector<4x1xf32> to vector<4x324xf32>
    %212 = arith.mulf %207, %211 : vector<4x324xf32>
    %213 = arith.addf %16, %212 : vector<4x324xf32>
    %c0_84 = arith.constant 0 : index
    %c0_85 = arith.constant 0 : index
    %c0_86 = arith.constant 0 : index
    %214 = vector.load %arg6[%c0_84, %c0_85, %c0_86] : memref<1x4x324xf32, #tpu.memory_space<vmem>>, vector<1x4x324xf32>
    %215 = vector.shape_cast %214 : vector<1x4x324xf32> to vector<4x324xf32>
    %216 = vector.shape_cast %213 : vector<4x324xf32> to vector<1x4x324xf32>
    tpu.vector_store %arg6[%c0_84, %c0_85, %c0_86], %216 {strides = array<i32>} : memref<1x4x324xf32, #tpu.memory_space<vmem>>, vector<1x4x324xf32>,
    return
  }
  func.func @transform_0(%arg0: i32) -> (i32, i32, i32) {
    %c0_i32 = arith.constant 0 : i32
    %c0_i32_0 = arith.constant 0 : i32
    %c0_i32_1 = arith.constant 0 : i32
    return %arg0, %c0_i32, %c0_i32_0 : i32, i32, i32
  }
  func.func @transform_1(%arg0: i32) -> (i32, i32, i32) {
    %c0_i32 = arith.constant 0 : i32
    %c0_i32_0 = arith.constant 0 : i32
    %c0_i32_1 = arith.constant 0 : i32
    %c0_i32_2 = arith.constant 0 : i32
    return %c0_i32, %c0_i32_0, %c0_i32_1 : i32, i32, i32
  }
  func.func @transform_2(%arg0: i32) -> (i32, i32, i32) {
    %c0_i32 = arith.constant 0 : i32
    %c0_i32_0 = arith.constant 0 : i32
    %c0_i32_1 = arith.constant 0 : i32
    %c0_i32_2 = arith.constant 0 : i32
    return %c0_i32, %c0_i32_0, %c0_i32_1 : i32, i32, i32
  }
  func.func @transform_3(%arg0: i32) -> (i32, i32) {
    %c0_i32 = arith.constant 0 : i32
    %c0_i32_0 = arith.constant 0 : i32
    %c0_i32_1 = arith.constant 0 : i32
    return %c0_i32, %c0_i32_0 : i32, i32
  }
  func.func @transform_4(%arg0: i32) -> (i32, i32) {
    %c0_i32 = arith.constant 0 : i32
    %c0_i32_0 = arith.constant 0 : i32
    %c0_i32_1 = arith.constant 0 : i32
    return %c0_i32, %c0_i32_0 : i32, i32
  }
  func.func @transform_5(%arg0: i32) -> (i32, i32, i32) {
    %c0_i32 = arith.constant 0 : i32
    %c0_i32_0 = arith.constant 0 : i32
    %c0_i32_1 = arith.constant 0 : i32
    return %arg0, %c0_i32, %c0_i32_0 : i32, i32, i32
  }
}

</mosaic_0001>

<bundles_post_ra>
// kernel: tpu_custom_call.1
= control target key start
LH: loop header
LB: loop body
LE: loop exit
PB: predicated region body
PF: predicated region fallthrough
CT: control target
= control target key end

     0   :  { %10 = vsyncpa [#allocation3], 0  ;;  %s2998_s0 = inlined_call_operand.vmem [shape: f32[2,4,324], index: 0, kind: input, shape index: {}]   ;;  %s2999_s1 = inlined_call_operand.vmem [shape: f32[9,4,4], index: 1, kind: input, shape index: {}]   ;;  %s3000_s2 = inlined_call_operand.vmem [shape: f32[9,4,4], index: 2, kind: input, shape index: {}]   ;;  %s3001_s3 = inlined_call_operand.vmem [shape: s32[1,324], index: 3, kind: input, shape index: {}]   ;;  %s3002_s4 = inlined_call_operand.vmem [shape: s32[1,324], index: 4, kind: input, shape index: {}]   ;;  %s3003_s5 = inlined_call_operand.hbm [shape: f32[2,4,324], index: 5, kind: output, shape index: {}]  }
   0x1   :  { %12 = vsyncpa [#allocation3 + $0x1], 0  ;;  %s2494_s18 = smov 0   ;;  %s2496_s19 = smov 0  }
   0x2   :  { %s2498_s20 = smov 0   ;;  %s2500_s21 = smov 0  }
   0x3 LB: > { %s2515_s22 = sadd.s32 4294967295, %s2436_s21   ;;  %s2169_s23 = sadd.s32 4294967294, %s2436_s21   ;;  %s2436_s21 = sphi %s2500_s21, %s3035_s21   ;;  %s2432_s20 = sphi %s2498_s20, %s3034_s20   ;;  %s2428_s19 = sphi %s2496_s19, %s3033_s19   ;;  %s2424_s18 = sphi %s2494_s18, %s3032_s18  }
   0x4   : > { %s2519_s24 = sadd.s32 1, %s2436_s21   ;;  %s135_s25 = sadd.s32 1, %s2432_s20 }
   0x5   : > { %s132_s26 = ssub.s32 %s2436_s21, %s2519_s24  ;;  %p145_p0 = scmp.ne.s32.totalorder %s2432_s20, %s2428_s19 }
   0x6   : > { %p133_p1 = scmp.eq.s32.totalorder %s132_s26, 0  ;;  %p146_p2 = scmp.eq.s32.totalorder %s2515_s22, 1 }
   0x7   : > { %p151_p3 = scmp.ne.s32.totalorder %s2428_s19, %s2424_s18  ;;  %p152_p4 = scmp.eq.s32.totalorder %s2169_s23, 1 }
   0x8   : > { %s2530_s27 = scalar_select %p133_p1, %s2432_s20, %s135_s25  }
   0x9   : > { %p2532_p5 = por %p146_p2, %p145_p0  ;;  %p2536_p6 = por %p152_p4, %p151_p3 }
   0xa   : > { %p2172_p7 = scmp.ge.s32.totalorder %s2436_s21, 1  ;;  %p190_p8 = scmp.lt.s32.totalorder %s2436_s21, 3 }
   0xc   : > { %p191_p9 = pnand %p2172_p7, %p190_p8 }
   0xd   : > { %p218_p10 = scmp.lt.s32.totalorder (!%p191_p9), %s2515_s22, 1  ;;  %s2438_s10 = smov (!%p191_p9), 79  }
   0xe   : > { %194 = sbr.rel (%p191_p9) target bundleno = 1783 (0x6f7), region = 40  ;;  %s2439_s11 = smov (!%p191_p9), 19  }
   0xf   : > { %s2440_s12 = smov (!%p191_p9), 18   ;;  %s2441_s13 = smov (!%p191_p9), 78  }
  0x10   : > { %s2442_s14 = smov (!%p191_p9), 17   ;;  %s2443_s15 = smov (!%p191_p9), 1  }
  0x11   : > { %s2444_s16 = smov (!%p191_p9), 77   ;;  %s2445_s17 = smov (!%p191_p9), 127  }
  0x12   : > { %s2446_s23 = smov (!%p191_p9), 61   ;;  %s2447_s25 = smov (!%p191_p9), 111  }
  0x13   : > { %s219_s30 = scalar_select %p218_p10, %s2515_s22, 1  ;;  %vm256_vm0 = vcmask 154624   ;;  %vm289_vm1 = vcmask 1043456   ;;  %vm285_vm2 = vcmask 31744   ;;  %v236_v45 = vld [vmem:[%s2999_s1] sm:$0xf] }
  0x14   : > { %s2448_s26 = smov 67   ;;  %s3009_s7 = smov 51   ;;  %vm280_vm3 = vcmask 146432   ;;  %v2175_v50 = vld [vmem:[%s2999_s1 + $0x4] sm:$0xf]  ;;  %vm543_vm4 = vcmask 7168  }
  0x15   : > { %s2303_s6 = smul.u32 12, %s219_s30  ;;  %s3005_s30 = smov 109   ;;  %vm446_vm5 = vcmask 138240   ;;  %v2188_v61 = vld [vmem:[%s2999_s1 + $0x8] sm:$0xf]  ;;  %vm715_vm6 = vcmask 1039360  }
  0x16   : > { %s3004_s8 = smov 50   ;;  %vm724_vm7 = vcmask 547840   ;;  %vm813_vm8 = vcmask 908288   ;;  %vm3014_vm9 = vcmask 900096   ;;  %vm3013_vm10 = vcmask 416768  }
  0x17   : > { %s222_s9 = scalar_lea.vmem %s2998_s0, %s2303_s6  ;;  %s3007_s6 = smov 110   ;;  %vm3011_vm11 = vcmask 400384   ;;  %vm3012_vm12 = vcmask 408576   ;;  %vm3010_vm13 = vcmask 891904  }
  0x18   : > { %v2547_v0 = vld [vmem:[%s222_s9 + $0x8] sm:$0xf]  ;;  %v2551_v1 = vld [vmem:[%s222_s9] sm:$0xff]  ;;  %s2453_s9 = smov 49  }
  0x19   : > { %238 = vst [vmem:[#allocation1] ss:$2 sm:$0xff] %v2547_v0 }
  0x1a   : > { %246 = vst [vmem:[#allocation1 + $0x10] ss:$2 sm:$0xff] %v2547_v0 }
  0x20   : > { %v239_v2 = vld.sshfl [vmem:[#allocation1] sm:$0xff pattern:$0x75316420] }
  0x21   : > { %244 = vst [vmem:[#allocation1] ss:$2 sm:$0xff] %v2551_v1  ;;  %v249_v3 = vld.sshfl [vmem:[#allocation1 + $0x10] sm:$0xff pattern:$0x75316420]  ;;  %240 = vrot.lane.b32.xlu2 %v239_v2, %s2438_s10 }
  0x22   : > { %254 = vrot.lane.b32.xlu0 %v249_v3, %s2439_s11  ;;  %270 = vst [vmem:[#allocation1 + $0x10] ss:$2 sm:$0xff] %v2547_v0 }
  0x28   : > { %v247_v4 = vld.sshfl [vmem:[#allocation1] sm:$0xff pattern:$0x75316420]  ;;  %v248_v5 = vld.sshfl [vmem:[#allocation1 + $0x8] sm:$0xff pattern:$0x75316420] }
  0x29   : > { %263 = vst [vmem:[#allocation1] ss:$2 sm:$0xff] %v2547_v0  ;;  %v273_v6 = vld.sshfl [vmem:[#allocation1 + $0x10] sm:$0xff pattern:$0x75316420]  ;;  %250 = vrot.lane.b32.xlu2 %v247_v4, %s2439_s11 }
  0x2a   : > { %436 = vst [vmem:[#allocation1 + $0x10] ss:$2 sm:$0xff] %v2547_v0  ;;  %278 = vrot.lane.b32.xlu0 %v273_v6, %s2440_s12 }
  0x30   : > { %v264_v7 = vld.sshfl [vmem:[#allocation1] sm:$0xff pattern:$0x75316420] }
  0x31   : > { %265 = vrot.lane.b32.xlu1 %v264_v7, %s2441_s13  ;;  %268 = vst [vmem:[#allocation1] ss:$2 sm:$0xff] %v2551_v1  ;;  %v439_v8 = vld.sshfl [vmem:[#allocation1 + $0x10] sm:$0xff pattern:$0x75316420]  ;;  %252 = vrot.lane.b32.xlu2 %v248_v5, %s2439_s11 }
  0x32   : > { %533 = vst [vmem:[#allocation1 + $0x10] ss:$2 sm:$0xff] %v2547_v0  ;;  %v2195_v5 = vld [vmem:[%s2999_s1 + $0xc] sm:$0xf] }
  0x38   : > { %v271_v9 = vld.sshfl [vmem:[#allocation1] sm:$0xff pattern:$0x75316420]  ;;  %v272_v10 = vld.sshfl [vmem:[#allocation1 + $0x8] sm:$0xff pattern:$0x75316420] }
  0x39   : > { %444 = vrot.lane.b32.xlu1 %v439_v8, %s2442_s14  ;;  %276 = vrot.lane.b32.xlu0 %v272_v10, %s2440_s12  ;;  %429 = vst [vmem:[#allocation1] ss:$2 sm:$0xff] %v2547_v0  ;;  %v536_v11 = vld.sshfl [vmem:[#allocation1 + $0x10] sm:$0xff pattern:$0x75316420] }
  0x3a   : > { %625 = vst [vmem:[#allocation1 + $0x10] ss:$2 sm:$0xff] %v2547_v0  ;;  %v2202_v10 = vld [vmem:[%s2999_s1 + $0x10] sm:$0xf] }
  0x40   : > { %v430_v12 = vld.sshfl [vmem:[#allocation1] sm:$0xff pattern:$0x75316420] }
  0x41   : > { %274 = vrot.lane.b32.xlu1 %v271_v9, %s2440_s12  ;;  %434 = vst [vmem:[#allocation1] ss:$2 sm:$0xff] %v2551_v1  ;;  %v2571_v13 = vld.sshfl [vmem:[#allocation1 + $0x10] sm:$0xff pattern:$0x75316420]  ;;  %541 = vrot.lane.b32.xlu0 %v536_v11, %s2443_s15 }
  0x42   : > { %705 = vst [vmem:[#allocation1 + $0x10] ss:$2 sm:$0xff] %v2547_v0 }
  0x48   : > { %v437_v14 = vld.sshfl [vmem:[#allocation1] sm:$0xff pattern:$0x75316420]  ;;  %v438_v15 = vld.sshfl [vmem:[#allocation1 + $0x8] sm:$0xff pattern:$0x75316420] }
  0x49   : > { %440 = vrot.lane.b32.xlu1 %v437_v14, %s2442_s14  ;;  %v708_v16 = vld.sshfl [vmem:[#allocation1 + $0x10] sm:$0xff pattern:$0x75316420]  ;;  %526 = vst [vmem:[#allocation1] ss:$2 sm:$0xff] %v2547_v0  ;;  %431 = vrot.lane.b32.xlu0 %v430_v12, %s2444_s16 }
  0x4a   : > { %803 = vst [vmem:[#allocation1 + $0x10] ss:$2 sm:$0xff] %v2547_v0  ;;  %713 = vrot.lane.b32.xlu2 %v708_v16, %s2445_s17  ;;  %v2209_v12 = vld [vmem:[%s2999_s1 + $0x14] sm:$0xf] }
  0x50   : > { %v527_v17 = vld.sshfl [vmem:[#allocation1] sm:$0xff pattern:$0x75316420] }
  0x51   : > { %442 = vrot.lane.b32.xlu1 %v438_v15, %s2442_s14  ;;  %531 = vst [vmem:[#allocation1] ss:$2 sm:$0xff] %v2551_v1  ;;  %v806_v18 = vld.sshfl [vmem:[#allocation1 + $0x10] sm:$0xff pattern:$0x75316420] }
  0x52   : > { %901 = vst [vmem:[#allocation1 + $0x10] ss:$2 sm:$0xff] %v2547_v0  ;;  %528 = vrot.lane.b32.xlu2 %v527_v17, %s2446_s23 }
  0x58   : > { %v535_v19 = vld.sshfl [vmem:[#allocation1 + $0x8] sm:$0xff pattern:$0x75316420]  ;;  %v534_v20 = vld.sshfl [vmem:[#allocation1] sm:$0xff pattern:$0x75316420] }
  0x59   : > { %539 = vrot.lane.b32.xlu0 %v535_v19, %s2443_s15  ;;  %623 = vst [vmem:[#allocation1] ss:$2 sm:$0xff] %v2551_v1  ;;  %v904_v21 = vld.sshfl [vmem:[#allocation1 + $0x10] sm:$0xff pattern:$0x75316420]  ;;  %811 = vrot.lane.b32.xlu1 %v806_v18, %s2447_s25 }
  0x5a   : > { %999 = vst [vmem:[#allocation1 + $0x10] ss:$2 sm:$0xff] %v2547_v0  ;;  %537 = vrot.lane.b32.xlu2 %v534_v20, %s2443_s15  ;;  %v2216_v20 = vld [vmem:[%s2999_s1 + $0x18] sm:$0xf] }
  0x60   : > { %v2589_v22 = vld.sshfl [vmem:[#allocation1] sm:$0xff pattern:$0x75316420]  ;;  %v2591_v23 = vld.sshfl [vmem:[#allocation1 + $0x8] sm:$0xff pattern:$0x75316420] }
  0x61   : > { %703 = vst [vmem:[#allocation1] ss:$2 sm:$0xff] %v2551_v1  ;;  %v1002_v29 = vld.sshfl [vmem:[#allocation1 + $0x10] sm:$0xff pattern:$0x75316420] }
  0x68   : > { %v706_v24 = vld.sshfl [vmem:[#allocation1] sm:$0xff pattern:$0x75316420]  ;;  %v707_v25 = vld.sshfl [vmem:[#allocation1 + $0x8] sm:$0xff pattern:$0x75316420] }
  0x69   : > { %709 = vrot.lane.b32.xlu1 %v706_v24, %s2445_s17  ;;  %719 = vst [vmem:[#allocation1] ss:$2 sm:$0xff] %v2551_v1  ;;  %711 = vrot.lane.b32.xlu2 %v707_v25, %s2445_s17  ;;  %v2223_v25 = vld [vmem:[%s2999_s1 + $0x1c] sm:$0xf] }
  0x70   : > { %v720_v26 = vld.sshfl [vmem:[#allocation1] sm:$0xff pattern:$0x75316420] }
  0x71   : > { %721 = vrot.lane.b32.xlu0 %v720_v26, %s2448_s26  ;;  %801 = vst [vmem:[#allocation1] ss:$2 sm:$0xff] %v2551_v1 }
  0x78   : > { %v805_v27 = vld.sshfl [vmem:[#allocation1 + $0x8] sm:$0xff pattern:$0x75316420]  ;;  %v804_v28 = vld.sshfl [vmem:[#allocation1] sm:$0xff pattern:$0x75316420] }
  0x79   : > { %809 = vrot.lane.b32.xlu1 %v805_v27, %s2447_s25  ;;  %807 = vrot.lane.b32.xlu0 %v804_v28, %s2447_s25  ;;  %817 = vst [vmem:[#allocation1] ss:$2 sm:$0xff] %v2551_v1 }
  0x7b   : > { %v241_v31 = vpop.permute.xlu2 %240 }
  0x80   : > { %v818_v30 = vld.sshfl [vmem:[#allocation1] sm:$0xff pattern:$0x75316420] }
  0x81   : > { %1007 = vrot.lane.b32.xlu1 %v1002_v29, %s3005_s30  ;;  %909 = vrot.lane.b32.xlu0 %v904_v21, %s3007_s6  ;;  %899 = vst [vmem:[#allocation1] ss:$2 sm:$0xff] %v2551_v1 }
  0x83   : > { %v251_v35 = vpop.permute.xlu2 %250 }
  0x84   : > { %v260_v40 = vsel %vm256_vm0, %v241_v31, %v251_v35  ;;  %v2230_v31 = vld [vmem:[%s2999_s1 + $0x20] sm:$0xf] }
  0x85   : > { %2182 = vmatpush.msk.msra.mxu3 %vm289_vm1, %v260_v40 }
  0x86   : > { %2183 = vmatmul.msk.f32.vlgmr.msra.gmra.mxu3 %vm285_vm2, %v236_v45 }
  0x88   : > { %v903_v32 = vld.sshfl [vmem:[#allocation1 + $0x8] sm:$0xff pattern:$0x75316420]  ;;  %v902_v33 = vld.sshfl [vmem:[#allocation1] sm:$0xff pattern:$0x75316420] }
  0x89   : > { %819 = vrot.lane.b32.xlu1 %v818_v30, %s3009_s7  ;;  %907 = vrot.lane.b32.xlu2 %v903_v32, %s3007_s6  ;;  %915 = vst [vmem:[#allocation1] ss:$2 sm:$0xff] %v2551_v1  ;;  %s2455_s7 = smov 126  }
  0x8b   : > { %v253_v39 = vpop.permute.xlu2 %252 }
  0x8c   : > { %v257_v54 = vsel %vm256_vm0, %v251_v35, %v253_v39 }
  0x90   : > { %v916_v34 = vld.sshfl [vmem:[#allocation1] sm:$0xff pattern:$0x75316420] }
  0x91   : > { %917 = vrot.lane.b32.xlu0 %v916_v34, %s3004_s8  ;;  %997 = vst [vmem:[#allocation1] ss:$2 sm:$0xff] %v2551_v1  ;;  %905 = vrot.lane.b32.xlu2 %v902_v33, %s3007_s6  ;;  %s2456_s8 = smov 66   ;;  %s2459_s6 = smov 62  }
  0x94   : > { %v255_v36 = vpop.permute.xlu0 %254 }
  0x95   : > { %v258_v52 = vsel %vm256_vm0, %v253_v39, %v255_v36 }
  0x98   : > { %v1001_v37 = vld.sshfl [vmem:[#allocation1 + $0x8] sm:$0xff pattern:$0x75316420]  ;;  %v1000_v38 = vld.sshfl [vmem:[#allocation1] sm:$0xff pattern:$0x75316420] }
  0x99   : > { %1005 = vrot.lane.b32.xlu1 %v1001_v37, %s3005_s30  ;;  %1003 = vrot.lane.b32.xlu0 %v1000_v38, %s3005_s30  ;;  %1013 = vst [vmem:[#allocation1] ss:$2 sm:$0xff] %v2551_v1  ;;  %s2458_s30 = smov 2  }
  0x9c   : > { %v279_v42 = vpop.permute.xlu0 %278 }
  0xa0   : > { %v1014_v41 = vld.sshfl [vmem:[#allocation1] sm:$0xff pattern:$0x75316420] }
  0xa1   : > { %1015 = vrot.lane.b32.xlu2 %v1014_v41, %s2453_s9 }
  0xa3   : > { %v266_v43 = vpop.permute.xlu1 %265 }
  0xa4   : > { %v2617_v44 = vpop.permute.xlu2 %713 }
  0xab   : > { %v445_v46 = vpop.permute.xlu1 %444  ;;  %v277_v47 = vpop.permute.xlu0 %276 }
  0xac   : > { %v282_v48 = vsel %vm280_vm3, %v277_v47, %v279_v42  ;;  %v529_v49 = vpop.permute.xlu2 %528 }
  0xad   : > { %2180 = vmatpush.msk.msra.mxu2 %vm289_vm1, %v282_v48 }
  0xae   : > { %2181 = vmatmul.msk.f32.vlgmr.msra.gmra.mxu2 %vm285_vm2, %v2175_v50 }
  0xb3   : > { %v275_v51 = vpop.permute.xlu1 %274  ;;  %v542_v53 = vpop.permute.xlu0 %541 }
  0xb4   : > { %v281_v55 = vsel %vm280_vm3, %v275_v51, %v277_v47  ;;  %v284_v56 = vsel %vm280_vm3, %v266_v43, %v275_v51  ;;  %v538_v57 = vpop.permute.xlu2 %537 }
  0xb5   : > { %2178 = vmatpush.msk.msra.mxu1 %vm289_vm1, %v281_v55  ;;  %2176 = vmatpush.msk.msra.mxu0 %vm289_vm1, %v284_v56  ;;  %v547_v58 = vsel %vm543_vm4, %v529_v49, %v538_v57 }
  0xb6   : > { %2177 = vmatmul.msk.f32.vlgmr.msra.gmra.mxu0 %vm285_vm2, %v2175_v50  ;;  %2179 = vmatmul.msk.f32.vlgmr.msra.gmra.mxu1 %vm285_vm2, %v2175_v50 }
  0xb7   : > { %2186 = vmatpush.msk.msrb.mxu1 %vm289_vm1, %v258_v52  ;;  %2184 = vmatpush.msk.msrb.mxu0 %vm289_vm1, %v257_v54 }
  0xb9   : > { %2196 = vmatpush.msk.msra.mxu1 %vm289_vm1, %v547_v58 }
  0xbb   : > { %v441_v59 = vpop.permute.xlu1 %440  ;;  %v432_v60 = vpop.permute.xlu0 %431 }
  0xbc   : > { %v450_v62 = vsel %vm446_vm5, %v432_v60, %v441_v59 }
  0xbd   : > { %2189 = vmatpush.msk.msrb.mxu2 %vm289_vm1, %v450_v62 }
  0xbe   : > { %2190 = vmatmul.msk.f32.vlgmr.msrb.gmra.mxu2 %vm285_vm2, %v2188_v61  ;;  %2185 = vmatmul.msk.f32.vlgmr.msrb.gmra.mxu0 %vm285_vm2, %v236_v45 }
  0xbf   : > { %2187 = vmatmul.msk.f32.vlgmr.msrb.gmra.mxu1 %vm285_vm2, %v236_v45 }
  0xc0   : > { %2205 = vmatpush.msk.msrb.mxu1 %vm289_vm1, %v2591_v23 }
  0xc3   : > { %v443_v63 = vpop.permute.xlu1 %442  ;;  %v712_v2 = vpop.permute.xlu2 %711 }
  0xc4   : > { %v448_v3 = vsel %vm446_vm5, %v443_v63, %v445_v46  ;;  %v447_v4 = vsel %vm446_vm5, %v441_v59, %v443_v63  ;;  %v717_v6 = vsel %vm715_vm6, %v712_v2, %v2617_v44  ;;  %v2730_v59 = vld [vmem:[%s3001_s3] sm:$0x7] }
  0xc5   : > { %2193 = vmatpush.msk.msra.mxu0 %vm289_vm1, %v448_v3  ;;  %2191 = vmatpush.msk.msrb.mxu3 %vm289_vm1, %v447_v4  ;;  %vm225_vm14 = vcmp.ge.s32.totalorder %v2730_v59, 1  ;;  %vm226_vm15 = vcmp.le.s32.totalorder %v2730_v59, 16 }
  0xc6   : > { %2192 = vmatmul.msk.f32.vlgmr.msrb.gmra.mxu3 %vm285_vm2, %v2188_v61  ;;  %2194 = vmatmul.msk.f32.vlgmr.msra.gmra.mxu0 %vm285_vm2, %v2188_v61 }
  0xc7   : > { %2203 = vmatpush.msk.msrb.mxu0 %vm289_vm1, %v2589_v22  ;;  %2197 = vmatmul.msk.f32.vlgmr.msra.gmra.mxu1 %vm285_vm2, %v2195_v5 }
  0xc9   : > { %2212 = vmatpush.msk.msra.mxu0 %vm289_vm1, %v717_v6 }
  0xcb   : > { %v540_v7 = vpop.permute.xlu0 %539  ;;  %v812_v11 = vpop.permute.xlu1 %811 }
  0xcc   : > { %v544_v8 = vsel %vm543_vm4, %v538_v57, %v540_v7  ;;  %v545_v9 = vsel %vm543_vm4, %v540_v7, %v542_v53 }
  0xcd   : > { %2200 = vmatpush.msk.msra.mxu3 %vm289_vm1, %v545_v9  ;;  %2198 = vmatpush.msk.msra.mxu2 %vm289_vm1, %v544_v8 }
  0xce   : > { %2199 = vmatmul.msk.f32.vlgmr.msra.gmra.mxu2 %vm285_vm2, %v2195_v5  ;;  %2201 = vmatmul.msk.f32.vlgmr.msra.gmra.mxu3 %vm285_vm2, %v2195_v5 }
  0xcf   : > { %2204 = vmatmul.msk.f32.vlgmr.msrb.gmra.mxu0 %vm285_vm2, %v2202_v10  ;;  %2207 = vmatpush.msk.msrb.mxu2 %vm289_vm1, %v2571_v13 }
  0xd0   : > { %2206 = vmatmul.msk.f32.vlgmr.msrb.gmra.mxu1 %vm285_vm2, %v2202_v10 }
  0xd6   : > { %2208 = vmatmul.msk.f32.vlgmr.msrb.gmra.mxu2 %vm285_vm2, %v2202_v10 }
  0xd7   : > { %2213 = vmatmul.msk.f32.vlgmr.msra.gmra.mxu0 %vm285_vm2, %v2209_v12 }
  0xdb   : > { %v710_v14 = vpop.permute.xlu1 %709 }
  0xdc   : > { %v716_v15 = vsel %vm715_vm6, %v710_v14, %v712_v2  ;;  %v2735_v2 = vld [vmem:[%s3002_s4] sm:$0x7] }
  0xdd   : > { %2210 = vmatpush.msk.msrb.mxu3 %vm289_vm1, %v716_v15 }
  0xde   : > { %2211 = vmatmul.msk.f32.vlgmr.msrb.gmra.mxu3 %vm285_vm2, %v2209_v12 }
  0xe3   : > { %v722_v13 = vpop.permute.xlu0 %721  ;;  %v908_v16 = vpop.permute.xlu2 %907 }
  0xe4   : > { %v725_v17 = vsel %vm724_vm7, %v2617_v44, %v722_v13 }
  0xe5   : > { %2214 = vmatpush.msk.msra.mxu1 %vm289_vm1, %v725_v17 }
  0xe6   : > { %2215 = vmatmul.msk.f32.vlgmr.msra.gmra.mxu1 %vm285_vm2, %v2209_v12 }
  0xeb   : > { %v810_v18 = vpop.permute.xlu1 %809  ;;  %v808_v19 = vpop.permute.xlu0 %807 }
  0xec   : > { %v815_v21 = vsel %vm813_vm8, %v810_v18, %v812_v11  ;;  %v814_v22 = vsel %vm813_vm8, %v808_v19, %v810_v18  ;;  %v906_v23 = vpop.permute.xlu2 %905  ;;  %v2454_v19 = vmov 0.0  }
  0xed   : > { %2217 = vmatpush.msk.msra.mxu2 %vm289_vm1, %v814_v22  ;;  %2219 = vmatpush.msk.msra.mxu3 %vm289_vm1, %v815_v21  ;;  %v912_v24 = vsel %vm3014_vm9, %v906_v23, %v908_v16 }
  0xee   : > { %2218 = vmatmul.msk.f32.vlgmr.msra.gmra.mxu2 %vm285_vm2, %v2216_v20  ;;  %2220 = vmatmul.msk.f32.vlgmr.msra.gmra.mxu3 %vm285_vm2, %v2216_v20 }
  0xef   : > { %2224 = vmatpush.msk.msrb.mxu1 %vm289_vm1, %v912_v24 }
  0xf0   : > { %2225 = vmatmul.msk.f32.vlgmr.msrb.gmra.mxu1 %vm285_vm2, %v2223_v25 }
  0xf3   : > { %v1008_v26 = vpop.permute.xlu1 %1007  ;;  %v910_v27 = vpop.permute.xlu0 %909 }
  0xf4   : > { %v913_v28 = vsel %vm3014_vm9, %v908_v16, %v910_v27 }
  0xf5   : > { %2226 = vmatpush.msk.msrb.mxu2 %vm289_vm1, %v913_v28 }
  0xf6   : > { %2227 = vmatmul.msk.f32.vlgmr.msrb.gmra.mxu2 %vm285_vm2, %v2223_v25 }
  0xfb   : > { %v820_v29 = vpop.permute.xlu1 %819  ;;  %v1016_v30 = vpop.permute.xlu2 %1015 }
  0xfc   : > { %v823_v32 = vsel %vm3013_vm10, %v812_v11, %v820_v29  ;;  %v1019_v33 = vsel %vm3011_vm11, %v1008_v26, %v1016_v30  ;;  %vm228_vm11 = vcmp.ge.s32.totalorder %v2735_v2, 1  ;;  %vm230_vm10 = vcmp.le.s32.totalorder %v2735_v2, 16 }
  0xfd   : > { %2221 = vmatpush.msk.msrb.mxu0 %vm289_vm1, %v823_v32  ;;  %2235 = vmatpush.msk.msra.mxu2 %vm289_vm1, %v1019_v33 }
  0xfe   : > { %2222 = vmatmul.msk.f32.vlgmr.msrb.gmra.mxu0 %vm285_vm2, %v2216_v20  ;;  %2236 = vmatmul.msk.f32.vlgmr.msra.gmra.mxu2 %vm285_vm2, %v2230_v31 }
 0x103   : > { %v918_v34 = vpop.permute.xlu0 %917 }
 0x104   : > { %v921_v35 = vsel %vm3012_vm12, %v910_v27, %v918_v34 }
 0x105   : > { %2228 = vmatpush.msk.msrb.mxu3 %vm289_vm1, %v921_v35 }
 0x106   : > { %2229 = vmatmul.msk.f32.vlgmr.msrb.gmra.mxu3 %vm285_vm2, %v2223_v25 }
 0x109   : > { %v384_v43 = vpop.f32.mrf.mxu3 }
 0x10b   : > { %v1006_v36 = vpop.permute.xlu1 %1005  ;;  %v1004_v37 = vpop.permute.xlu0 %1003 }
 0x10c   : > { %v1011_v38 = vsel %vm3010_vm13, %v1006_v36, %v1008_v26  ;;  %v1010_v39 = vsel %vm3010_vm13, %v1004_v37, %v1006_v36  ;;  %vm227_vm13 = vmand %vm225_vm14, %vm226_vm15  ;;  %vm1156_vm14 = vcmask 1031168  }
 0x10d   : > { %2231 = vmatpush.msk.msra.mxu0 %vm289_vm1, %v1010_v39  ;;  %2233 = vmatpush.msk.msra.mxu1 %vm289_vm1, %v1011_v38  ;;  %vm229_vm12 = vmand %vm227_vm13, %vm228_vm11  ;;  %vm1146_vm13 = vcmp.eq.s32.totalorder %v2735_v2, 0 }
 0x10e   : > { %2232 = vmatmul.msk.f32.vlgmr.msra.gmra.mxu0 %vm285_vm2, %v2230_v31  ;;  %2234 = vmatmul.msk.f32.vlgmr.msra.gmra.mxu1 %vm285_vm2, %v2230_v31  ;;  %vm231_vm9 = vmand %vm229_vm12, %vm230_vm10 }
 0x10f   : > { %v2174_v20 = vsel %vm231_vm9, 1.0, %v2454_v19  ;;  %vm3015_vm9 = vcmask 551936  }
 0x110   : > { %v2741_v24 = vperm.slane %v2174_v20, 0  ;;  %v2743_v25 = vperm.slane %v2174_v20, 1  ;;  %v2745_v30 = vperm.slane %v2174_v20, 2 }
 0x131   : > { %v354_v40 = vpop.f32.mrf.mxu2 }
 0x133   : > { %v314_v41 = vpop.f32.mrf.mxu0  ;;  %v334_v42 = vpop.f32.mrf.mxu1 }
 0x134   : > { %v385_v55 = vadd.f32 %v384_v43, %v314_v41 }
 0x13b   : > { %v404_v45 = vpop.f32.mrf.mxu0 }
 0x13c   : > { %v424_v46 = vpop.f32.mrf.mxu1  ;;  %v405_v56 = vadd.f32 %v404_v45, %v334_v42 }
 0x13d   : > { %v425_v57 = vadd.f32 %v424_v46, %v354_v40 }
 0x141   : > { %v478_v44 = vpop.f32.mrf.mxu2 }
 0x142   : > { %v521_v60 = vadd.f32 %v478_v44, %v385_v55 }
 0x143   : > { %v518_v49 = vpop.f32.mrf.mxu0 }
 0x144   : > { %v575_v50 = vpop.f32.mrf.mxu1  ;;  %v523_v63 = vadd.f32 %v518_v49, %v425_v57 }
 0x145   : > { %v618_v5 = vadd.f32 %v575_v50, %v521_v60 }
 0x149   : > { %v498_v47 = vpop.f32.mrf.mxu3 }
 0x14a   : > { %v522_v62 = vadd.f32 %v498_v47, %v405_v56 }
 0x14c   : > { %v655_v53 = vpop.f32.mrf.mxu0 }
 0x14d   : > { %v675_v54 = vpop.f32.mrf.mxu1  ;;  %v698_v8 = vadd.f32 %v655_v53, %v618_v5 }
 0x151   : > { %v595_v48 = vpop.f32.mrf.mxu2  ;;  %v615_v51 = vpop.f32.mrf.mxu3 }
 0x152   : > { %v619_v6 = vadd.f32 %v595_v48, %v522_v62  ;;  %v620_v7 = vadd.f32 %v615_v51, %v523_v63 }
 0x154   : > { %v773_v3 = vpop.f32.mrf.mxu0  ;;  %v699_v11 = vadd.f32 %v675_v54, %v619_v6 }
 0x156   : > { %v797_v16 = vadd.f32 %v773_v3, %v699_v11 }
 0x159   : > { %v695_v52 = vpop.f32.mrf.mxu2 }
 0x15a   : > { %v700_v12 = vadd.f32 %v695_v52, %v620_v7 }
 0x161   : > { %v753_v61 = vpop.f32.mrf.mxu3 }
 0x162   : > { %v796_v13 = vadd.f32 %v753_v61, %v698_v8 }
 0x163   : > { %v793_v4 = vpop.f32.mrf.mxu1 }
 0x164   : > { %v798_v17 = vadd.f32 %v793_v4, %v700_v12 }
 0x16d   : > { %v949_v14 = vpop.f32.mrf.mxu1 }
 0x171   : > { %v851_v58 = vpop.f32.mrf.mxu2  ;;  %v871_v9 = vpop.f32.mrf.mxu3 }
 0x172   : > { %v894_v18 = vadd.f32 %v851_v58, %v796_v13  ;;  %v895_v21 = vadd.f32 %v871_v9, %v797_v16 }
 0x174   : > { %v992_v27 = vadd.f32 %v949_v14, %v894_v18 }
 0x179   : > { %v969_v10 = vpop.f32.mrf.mxu2 }
 0x17a   : > { %v993_v28 = vadd.f32 %v969_v10, %v895_v21 }
 0x17b   : > { %v891_v15 = vpop.f32.mrf.mxu0 }
 0x17c   : > { %v896_v22 = vadd.f32 %v891_v15, %v798_v17  ;;  %v2457_v17 = vmov 0  }
 0x17d   : > { %v1167_v18 = vsel %vm1146_vm13, 1, %v2457_v17  ;;  %vm1177_vm13 = vcmp.eq.s32.totalorder %v2735_v2, 17 }
 0x17e   : > { %v1168_v19 = vperm.slane %v1167_v18, 0 }
 0x180   : > { %vm1171_vm15 = vcmp.eq.s32.totalorder %v1168_v19, 1 }
 0x181   : > { %v1087_v26 = vpop.f32.mrf.mxu2 }
 0x189   : > { %v989_v23 = vpop.f32.mrf.mxu3 }
 0x18a   : > { %v994_v29 = vadd.f32 %v989_v23, %v896_v22 }
 0x18b   : > { %v1047_v31 = vpop.f32.mrf.mxu0  ;;  %v1067_v32 = vpop.f32.mrf.mxu1 }
 0x18c   : > { %v1090_v33 = vadd.f32 %v1047_v31, %v992_v27  ;;  %v1091_v34 = vadd.f32 %v1067_v32, %v993_v28  ;;  %v1092_v35 = vadd.f32 %v1087_v26, %v994_v29  ;;  %v1170_v26 = vperm.slane %v1167_v18, 2 }
 0x18d   : > { %v1169_v31 = vperm.slane %v1167_v18, 1 }
 0x18e   : > { %v1100_v36 = vmul.f32 %v2741_v24, %v1090_v33  ;;  %v1101_v37 = vmul.f32 %v2743_v25, %v1091_v34  ;;  %v1102_v38 = vmul.f32 %v2745_v30, %v1092_v35 }
 0x190   : > { %v1103_v39 = vsel %vm289_vm1, %v1100_v36, 0.0  ;;  %v1104_v40 = vsel %vm289_vm1, %v1101_v37, 0.0  ;;  %v1107_v42 = vsel %vm3015_vm9, %v1102_v38, 0.0 }
 0x191   : > { %v1105_v41 = vadd.f32 %v1104_v40, %v1103_v39 }
 0x193   : > { %v1108_v43 = vadd.f32 %v1107_v42, %v1105_v41 }
 0x195   : > { %1109 = vadd.xlane.f32.xlu2 %v1108_v43 }
 0x208   : > { %v1110_v44 = vpop.xlane.xlu2 %1109 }
 0x209   : > { %v1111_v45 = vmul.f32 0.00390625, %v1110_v44 }
 0x20b   : > { %v1112_v46 = vsub.f32 %v1090_v33, %v1111_v45  ;;  %v1113_v47 = vsub.f32 %v1091_v34, %v1111_v45  ;;  %v1114_v48 = vsub.f32 %v1092_v35, %v1111_v45  ;;  %v1197_v34 = vsel %vm1177_vm13, 1, %v2457_v17 }
 0x20c   : > { %v1198_v35 = vperm.slane %v1197_v34, 0  ;;  %v1200_v40 = vperm.slane %v1197_v34, 2  ;;  %v1199_v41 = vperm.slane %v1197_v34, 1  ;;  %vm1217_vm13 = vcmask 752640  }
 0x20d   : > { %v1115_v49 = vmul.f32 %v1112_v46, %v2741_v24  ;;  %v1116_v50 = vmul.f32 %v1113_v47, %v2743_v25  ;;  %v1117_v51 = vmul.f32 %v1114_v48, %v2745_v30 }
 0x20f   : > { %v1118_v52 = vmul.f32 %v1115_v49, %v1115_v49  ;;  %v1119_v53 = vmul.f32 %v1116_v50, %v1116_v50  ;;  %v1120_v54 = vmul.f32 %v1117_v51, %v1117_v51 }
 0x211   : > { %v1121_v55 = vsel %vm289_vm1, %v1118_v52, 0.0  ;;  %v1122_v56 = vsel %vm289_vm1, %v1119_v53, 0.0  ;;  %v1124_v58 = vsel %vm3015_vm9, %v1120_v54, 0.0  ;;  %vm1201_vm9 = vcmp.eq.s32.totalorder %v1198_v35, 1 }
 0x212   : > { %v1123_v57 = vadd.f32 %v1122_v56, %v1121_v55 }
 0x214   : > { %v1125_v60 = vadd.f32 %v1124_v58, %v1123_v57 }
 0x216   : > { %1126 = vadd.xlane.f32.xlu0 %v1125_v60 }
 0x289   : > { %v1127_v61 = vpop.xlane.xlu0 %1126 }
 0x28a   : > { %v1128_v62 = vmul.f32 0.00390625, %v1127_v61 }
 0x28c   : > { %v1129_v63 = vadd.f32 1e-05, %v1128_v62 }
 0x28e   : > { %2370 = vrsqrt.f32 %v1129_v63  ;;  %vm1136_vm11 = vweird.f32 %v1129_v63 }
 0x294   : > { %v2371_v3 = vpop.eup %2370 }
 0x295   : > { %v1131_v4 = vmul.f32 %v2371_v3, %v1129_v63  ;;  %vm1137_vm10 = vweird.f32 %v2371_v3 }
 0x296   : > { %vm1138_vm12 = vmor %vm1136_vm11, %vm1137_vm10  ;;  %vm1165_vm10 = vcmask 539648   ;;  %vm1173_vm11 = vcmp.eq.s32.totalorder %v1170_v26, 1 }
 0x297   : > { %v1132_v5 = vmul.f32 %v2371_v3, %v1131_v4 }
 0x299   : > { %v1133_v6 = vmul.f32 0.5, %v1132_v5 }
 0x29b   : > { %v1134_v7 = vsub.f32 1.5, %v1133_v6 }
 0x29d   : > { %v1135_v8 = vmul.f32 %v2371_v3, %v1134_v7 }
 0x29f   : > { %v1139_v9 = vsel %vm1138_vm12, %v2371_v3, %v1135_v8  ;;  %vm1172_vm12 = vcmp.eq.s32.totalorder %v1169_v31, 1 }
 0x2a0   : > { %v1140_v10 = vmul.f32 %v1139_v9, %v1112_v46  ;;  %v1141_v12 = vmul.f32 %v1139_v9, %v1113_v47  ;;  %v1142_v15 = vmul.f32 %v1139_v9, %v1114_v48 }
 0x2a2   : > { %v1143_v11 = vmax.f32 %v1140_v10, 0.0  ;;  %v1144_v14 = vmax.f32 %v1141_v12, 0.0  ;;  %v1145_v13 = vmax.f32 %v1142_v15, 0.0 }
 0x2a4   : > { %1150 = vrot.lane.b32.xlu1 %v1143_v11, %s2455_s7 }
 0x2ac   : > { %1152 = vrot.lane.b32.xlu1 %v1144_v14, %s2455_s7 }
 0x2b4   : > { %1154 = vrot.lane.b32.xlu1 %v1145_v13, %s2455_s7  ;;  %s2460_s7 = smov 32  }
 0x2bc   : > { %1162 = vrot.lane.b32.xlu1 %v1143_v11, %s2456_s8  ;;  %s2461_s8 = smov 92  }
 0x316   : > { %v1151_v16 = vpop.permute.xlu1 %1150 }
 0x31e   : > { %v1153_v20 = vpop.permute.xlu1 %1152 }
 0x31f   : > { %v1157_v21 = vsel %vm1156_vm14, %v1151_v16, %v1153_v20 }
 0x320   : > { %v1174_v22 = vsel %vm1171_vm15, %v1157_v21, %v1143_v11  ;;  %vm1190_vm15 = vcmask 15360  }
 0x321   : > { %1184 = vrot.lane.b32.xlu2 %v1174_v22, %s2458_s30 }
 0x326   : > { %v1155_v23 = vpop.permute.xlu1 %1154 }
 0x327   : > { %v1158_v32 = vsel %vm1156_vm14, %v1153_v20, %v1155_v23  ;;  %vm1203_vm14 = vcmp.eq.s32.totalorder %v1200_v40, 1 }
 0x328   : > { %v1175_v33 = vsel %vm1172_vm12, %v1158_v32, %v1144_v14 }
 0x32e   : > { %v1163_v27 = vpop.permute.xlu1 %1162 }
 0x32f   : > { %v1166_v28 = vsel %vm1165_vm10, %v1155_v23, %v1163_v27  ;;  %vm1202_vm10 = vcmp.eq.s32.totalorder %v1199_v41, 1 }
 0x330   : > { %v1176_v29 = vsel %vm1173_vm11, %v1166_v28, %v1145_v13  ;;  %vm1226_vm11 = vcmask 261120   ;;  %v1268_v28 = vld [vmem:[%s3000_s2] sm:$0xf] }
 0x331   : > { %1188 = vrot.lane.b32.xlu0 %v1176_v29, %s2458_s30  ;;  %1179 = vrot.lane.b32.xlu1 %v1176_v29, %s2459_s6  ;;  %s2463_s6 = smov 36  }
 0x339   : > { %1186 = vrot.lane.b32.xlu1 %v1175_v33, %s2458_s30  ;;  %s2462_s30 = smov 96  }
 0x37b   : > { %v1185_v36 = vpop.permute.xlu2 %1184 }
 0x3a3   : > { %v1180_v37 = vpop.permute.xlu1 %1179  ;;  %v1189_v42 = vpop.permute.xlu0 %1188 }
 0x3a4   : > { %v1196_v38 = vsel %vm1190_vm15, %v1180_v37, %v1185_v36  ;;  %v2250_v37 = vld [vmem:[%s3000_s2 + $0x8] sm:$0xf] }
 0x3a5   : > { %v1204_v39 = vsel %vm1201_vm9, %v1196_v38, %v1174_v22  ;;  %vm1207_vm9 = vcmp.eq.s32.totalorder %v2730_v59, 0 }
 0x3a6   : > { %1223 = vrot.lane.b32.xlu0 %v1204_v39, %s2460_s7  ;;  %1211 = vrot.lane.b32.xlu1 %v1204_v39, %s2461_s8  ;;  %v1228_v47 = vsel %vm1207_vm9, 1, %v2457_v17  ;;  %vm1251_vm9 = vcmask 293888  }
 0x3a7   : > { %v1231_v48 = vperm.slane %v1228_v47, 2  ;;  %v1230_v54 = vperm.slane %v1228_v47, 1  ;;  %v1229_v55 = vperm.slane %v1228_v47, 0 }
 0x3a9   : > { %vm1234_vm12 = vcmp.eq.s32.totalorder %v1231_v48, 1 }
 0x3ab   : > { %v1187_v2 = vpop.permute.xlu1 %1186 }
 0x3ac   : > { %v1191_v43 = vsel %vm1190_vm15, %v1185_v36, %v1187_v2  ;;  %v1192_v44 = vsel %vm1190_vm15, %v1187_v2, %v1189_v42  ;;  %vm1233_vm15 = vcmp.eq.s32.totalorder %v1230_v54, 1 }
 0x3ad   : > { %v1206_v45 = vsel %vm1203_vm14, %v1192_v44, %v1176_v29  ;;  %v1205_v46 = vsel %vm1202_vm10, %v1191_v43, %v1175_v33  ;;  %vm1232_vm14 = vcmp.eq.s32.totalorder %v1229_v55, 1  ;;  %vm1238_vm10 = vcmp.eq.s32.totalorder %v2730_v59, 17  ;;  %v2257_v44 = vld [vmem:[%s3000_s2 + $0xc] sm:$0xf] }
 0x3ae   : > { %1215 = vrot.lane.b32.xlu2 %v1206_v45, %s2461_s8  ;;  %1213 = vrot.lane.b32.xlu1 %v1205_v46, %s2461_s8  ;;  %v1258_v62 = vsel %vm1238_vm10, 1, %v2457_v17  ;;  %v2237_v17 = vld [vmem:[%s3000_s2 + $0x4] sm:$0xf] }
 0x3af   : > { %v1259_v63 = vperm.slane %v1258_v62, 0  ;;  %v1260_v7 = vperm.slane %v1258_v62, 1  ;;  %v1261_v8 = vperm.slane %v1258_v62, 2 }
 0x408   : > { %v1216_v49 = vpop.permute.xlu2 %1215 }
 0x418   : > { %v1224_v50 = vpop.permute.xlu0 %1223  ;;  %v1212_v51 = vpop.permute.xlu1 %1211 }
 0x419   : > { %v1227_v52 = vsel %vm1226_vm11, %v1216_v49, %v1224_v50  ;;  %vm1262_vm11 = vcmp.eq.s32.totalorder %v1259_v63, 1  ;;  %v2264_v50 = vld [vmem:[%s3000_s2 + $0x10] sm:$0xf] }
 0x41a   : > { %v1237_v53 = vsel %vm1234_vm12, %v1227_v52, %v1206_v45  ;;  %vm1263_vm12 = vcmp.eq.s32.totalorder %v1260_v7, 1 }
 0x41b   : > { %1240 = vrot.lane.b32.xlu1 %v1237_v53, %s2462_s30 }
 0x420   : > { %v1214_v56 = vpop.permute.xlu1 %1213 }
 0x421   : > { %v1218_v57 = vsel %vm1217_vm13, %v1212_v51, %v1214_v56  ;;  %v1219_v58 = vsel %vm1217_vm13, %v1214_v56, %v1216_v49  ;;  %vm1264_vm13 = vcmp.eq.s32.totalorder %v1261_v8, 1 }
 0x422   : > { %v1236_v60 = vsel %vm1233_vm15, %v1219_v58, %v1205_v46  ;;  %v1235_v61 = vsel %vm1232_vm14, %v1218_v57, %v1204_v39  ;;  %v2271_v57 = vld [vmem:[%s3000_s2 + $0x14] sm:$0xf] }
 0x423   : > { %1249 = vrot.lane.b32.xlu1 %v1237_v53, %s2463_s6  ;;  %1247 = vrot.lane.b32.xlu0 %v1236_v60, %s2463_s6 }
 0x424   : > { %1245 = vrot.lane.b32.xlu2 %v1235_v61, %s2463_s6 }
 0x47e   : > { %v1246_v3 = vpop.permute.xlu2 %1245 }
 0x48d   : > { %v1241_v4 = vpop.permute.xlu1 %1240 }
 0x48e   : > { %v1257_v5 = vsel %vm1251_vm9, %v1241_v4, %v1246_v3 }
 0x48f   : > { %v2772_v6 = vsel %vm1262_vm11, %v1257_v5, %v1235_v61  ;;  %v2278_v61 = vld [vmem:[%s3000_s2 + $0x18] sm:$0xf] }
 0x490   : > { %1290 = vrot.lane.b32.xlu0 %v2772_v6, %s2440_s12 }
 0x495   : > { %v1248_v9 = vpop.permute.xlu0 %1247  ;;  %v1250_v10 = vpop.permute.xlu1 %1249 }
 0x496   : > { %v1252_v59 = vsel %vm1251_vm9, %v1246_v3, %v1248_v9  ;;  %v1253_v11 = vsel %vm1251_vm9, %v1248_v9, %v1250_v10 }
 0x497   : > { %v2776_v12 = vsel %vm1263_vm12, %v1252_v59, %v1236_v60  ;;  %v2778_v14 = vsel %vm1264_vm13, %v1253_v11, %v1237_v53 }
 0x498   : > { %1292 = vrot.lane.b32.xlu1 %v2776_v12, %s2440_s12  ;;  %1275 = vrot.lane.b32.xlu0 %v2772_v6, %s2439_s11 }
 0x499   : > { %1287 = vrot.lane.b32.xlu2 %v2778_v14, %s2441_s13  ;;  %s3021_s13 = smov 50  }
 0x4a0   : > { %1277 = vrot.lane.b32.xlu1 %v2776_v12, %s2439_s11  ;;  %1279 = vrot.lane.b32.xlu0 %v2778_v14, %s2439_s11  ;;  %s3019_s11 = smov 110  }
 0x4a1   : > { %1270 = vrot.lane.b32.xlu2 %v2778_v14, %s2438_s10  ;;  %s3018_s10 = smov 51  }
 0x4a8   : > { %1442 = vrot.lane.b32.xlu1 %v2778_v14, %s2444_s16  ;;  %1447 = vrot.lane.b32.xlu0 %v2776_v12, %s2442_s14  ;;  %s215_s16 = sand.u32 1, %s2428_s19  }
 0x4a9   : > { %1294 = vrot.lane.b32.xlu2 %v2778_v14, %s2440_s12  ;;  %s3020_s12 = smov 109  }
 0x4b0   : > { %1449 = vrot.lane.b32.xlu1 %v2778_v14, %s2442_s14  ;;  %1533 = vrot.lane.b32.xlu0 %v2772_v6, %s2443_s15 }
 0x4b1   : > { %1445 = vrot.lane.b32.xlu2 %v2772_v6, %s2442_s14 }
 0x4b8   : > { %1535 = vrot.lane.b32.xlu1 %v2776_v12, %s2443_s15  ;;  %1692 = vrot.lane.b32.xlu0 %v2772_v6, %s2445_s17 }
 0x4b9   : > { %1530 = vrot.lane.b32.xlu2 %v2778_v14, %s2446_s23  ;;  %s2302_s23 = smul.u32 12, %s215_s16 }
 0x4bb   : > { %s217_s7 = scalar_lea.vmem [#allocation2], %s2302_s23 }
 0x4bc   : > { %s2107_s8 = sshll.u32 %s217_s7, 4  ;;  %s2108_s8 = int_to_ptr.vmem [resolvable:$true] %s2107_s8 }
 0x4c0   : > { %1694 = vrot.lane.b32.xlu1 %v2776_v12, %s2445_s17  ;;  %1701 = vrot.lane.b32.xlu0 %v2772_v6, %s2448_s26 }
 0x4c1   : > { %1537 = vrot.lane.b32.xlu2 %v2778_v14, %s2443_s15 }
 0x4c8   : > { %1780 = vrot.lane.b32.xlu1 %v2772_v6, %s2447_s25  ;;  %1784 = vrot.lane.b32.xlu0 %v2778_v14, %s2447_s25 }
 0x4c9   : > { %1696 = vrot.lane.b32.xlu2 %v2778_v14, %s2445_s17  ;;  %s2304_s17 = smul.u32 12, %s2515_s22  ;;  %s2094_s22 = scalar_lea.sflag [#allocation3], %s215_s16 }
 0x4d0   : > { %1789 = vrot.lane.b32.xlu1 %v2772_v6, %s3018_s10  ;;  %1870 = vrot.lane.b32.xlu0 %v2776_v12, %s3019_s11 }
 0x4d1   : > { %1782 = vrot.lane.b32.xlu2 %v2776_v12, %s2447_s25 }
 0x4d8   : > { %1872 = vrot.lane.b32.xlu1 %v2778_v14, %s3019_s11  ;;  %1956 = vrot.lane.b32.xlu0 %v2772_v6, %s3020_s12 }
 0x4d9   : > { %1868 = vrot.lane.b32.xlu2 %v2772_v6, %s3019_s11 }
 0x4e0   : > { %1958 = vrot.lane.b32.xlu1 %v2776_v12, %s3020_s12  ;;  %1965 = vrot.lane.b32.xlu0 %v2772_v6, %s2453_s9  ;;  %s2105_s9 = scalar_lea.hbm %s3003_s5, %s2304_s17 }
 0x4e1   : > { %1877 = vrot.lane.b32.xlu2 %v2772_v6, %s3021_s13  ;;  %s2109_s30 = sshll.u32 %s2105_s9, 4  ;;  %s2394_s13 = scalar_lea.hbm %s3003_s5, 24  ;;  %s2110_s30 = int_to_ptr.hbm [resolvable:$true] %s2109_s30 }
 0x4e2   : > { %s2388_s6 = sshra.s32 %s2110_s30, 4  ;;  %s2389_s6 = int_to_ptr.hbm [resolvable:$true] %s2388_s6 }
 0x4e3   : > { %s2390_s10 = scalar_lea.hbm %s2389_s6, 12  ;;  %p2395_p0 = scmp.lt.s32.totalorder %s2389_s6, %s3003_s5 }
 0x4e4   : > { %p2391_p11 = scmp.ne.s32.totalorder %s2389_s6, %s2390_s10  ;;  %p2396_p1 = scmp.lt.s32.totalorder %s2394_s13, %s2390_s10 }
 0x4e6   : > { %p2392_p12 = pnand %p2391_p11, %p2532_p5  ;;  %p2397_p2 = por %p2396_p1, %p2395_p0 }
 0x4e8   : > { %p2393_p13 = pneg %p2392_p12 }
 0x4e9   : > { %1960 = vrot.lane.b32.xlu2 %v2778_v14, %s3020_s12 }
 0x4ea   : > { %p2398_p3 = pnand %p2397_p2, %p2393_p13 }
 0x4f3   : > { %v1288_v15 = vpop.permute.xlu2 %1287 }
 0x4fb   : > { %v1271_v13 = vpop.permute.xlu2 %1270 }
 0x502   : > { %v1291_v16 = vpop.permute.xlu0 %1290 }
 0x503   : > { %v1299_v18 = vsel %vm280_vm3, %v1288_v15, %v1291_v16  ;;  %v1295_v19 = vpop.permute.xlu2 %1294 }
 0x504   : > { %2238 = vmatpush.msk.msra.mxu3 %vm289_vm1, %v1299_v18 }
 0x505   : > { %2239 = vmatmul.msk.f32.vlgmr.msra.gmra.mxu3 %vm285_vm2, %v2237_v17 }
 0x50a   : > { %v1276_v20 = vpop.permute.xlu0 %1275  ;;  %v1293_v21 = vpop.permute.xlu1 %1292 }
 0x50b   : > { %v1284_v22 = vsel %vm256_vm0, %v1271_v13, %v1276_v20  ;;  %v1446_v23 = vpop.permute.xlu2 %1445  ;;  %v1296_v26 = vsel %vm280_vm3, %v1291_v16, %v1293_v21  ;;  %v1297_v27 = vsel %vm280_vm3, %v1293_v21, %v1295_v19  ;;  %vm3023_vm3 = vcmask 416768   ;;  %v2292_v16 = vld [vmem:[%s3000_s2 + $0x20] sm:$0xf] }
 0x50c   : > { %2240 = vmatpush.msk.msrb.mxu0 %vm289_vm1, %v1296_v26  ;;  %2242 = vmatpush.msk.msrb.mxu1 %vm289_vm1, %v1297_v27 }
 0x50d   : > { %2244 = vmatpush.msk.msrb.mxu2 %vm289_vm1, %v1284_v22  ;;  %2241 = vmatmul.msk.f32.vlgmr.msrb.gmra.mxu0 %vm285_vm2, %v2237_v17 }
 0x50e   : > { %2243 = vmatmul.msk.f32.vlgmr.msrb.gmra.mxu1 %vm285_vm2, %v2237_v17  ;;  %2245 = vmatmul.msk.f32.vlgmr.msrb.gmra.mxu2 %vm285_vm2, %v1268_v28 }
 0x512   : > { %v1280_v29 = vpop.permute.xlu0 %1279  ;;  %v1278_v31 = vpop.permute.xlu1 %1277 }
 0x513   : > { %v1281_v32 = vsel %vm256_vm0, %v1276_v20, %v1278_v31  ;;  %v1282_v33 = vsel %vm256_vm0, %v1278_v31, %v1280_v29  ;;  %v1531_v34 = vpop.permute.xlu2 %1530  ;;  %vm3022_vm0 = vcmask 900096  }
 0x514   : > { %2246 = vmatpush.msk.msrb.mxu3 %vm289_vm1, %v1281_v32  ;;  %2248 = vmatpush.msk.msra.mxu0 %vm289_vm1, %v1282_v33 }
 0x515   : > { %2247 = vmatmul.msk.f32.vlgmr.msrb.gmra.mxu3 %vm285_vm2, %v1268_v28  ;;  %2249 = vmatmul.msk.f32.vlgmr.msra.gmra.mxu0 %vm285_vm2, %v1268_v28 }
 0x51a   : > { %v1448_v35 = vpop.permute.xlu0 %1447  ;;  %v1443_v36 = vpop.permute.xlu1 %1442 }
 0x51b   : > { %v1451_v38 = vsel %vm446_vm5, %v1446_v23, %v1448_v35  ;;  %v1454_v39 = vsel %vm446_vm5, %v1443_v36, %v1446_v23  ;;  %v1538_v40 = vpop.permute.xlu2 %1537 }
 0x51c   : > { %2251 = vmatpush.msk.msra.mxu1 %vm289_vm1, %v1454_v39  ;;  %2253 = vmatpush.msk.msra.mxu2 %vm289_vm1, %v1451_v38 }
 0x51d   : > { %2252 = vmatmul.msk.f32.vlgmr.msra.gmra.mxu1 %vm285_vm2, %v2250_v37  ;;  %2254 = vmatmul.msk.f32.vlgmr.msra.gmra.mxu2 %vm285_vm2, %v2250_v37 }
 0x522   : > { %v1534_v41 = vpop.permute.xlu0 %1533  ;;  %v1450_v42 = vpop.permute.xlu1 %1449 }
 0x523   : > { %v1542_v2 = vsel %vm543_vm4, %v1531_v34, %v1534_v41  ;;  %v1452_v43 = vsel %vm446_vm5, %v1448_v35, %v1450_v42  ;;  %v1697_v45 = vpop.permute.xlu2 %1696  ;;  %vm3025_vm5 = vcmask 408576  }
 0x524   : > { %2255 = vmatpush.msk.msra.mxu3 %vm289_vm1, %v1452_v43  ;;  %2258 = vmatpush.msk.msrb.mxu0 %vm289_vm1, %v1542_v2 }
 0x525   : > { %2256 = vmatmul.msk.f32.vlgmr.msra.gmra.mxu3 %vm285_vm2, %v2250_v37  ;;  %2259 = vmatmul.msk.f32.vlgmr.msrb.gmra.mxu0 %vm285_vm2, %v2257_v44 }
 0x526   : > { %2267 = vmatpush.msk.msra.mxu0 %vm289_vm1, %v2776_v12  ;;  %2265 = vmatpush.msk.msrb.mxu3 %vm289_vm1, %v2772_v6  ;;  %v2285_v6 = vld [vmem:[%s3000_s2 + $0x1c] sm:$0xf] }
 0x52a   : > { %v1693_v46 = vpop.permute.xlu0 %1692  ;;  %v1536_v47 = vpop.permute.xlu1 %1535 }
 0x52b   : > { %v1539_v48 = vsel %vm543_vm4, %v1534_v41, %v1536_v47  ;;  %v1540_v49 = vsel %vm543_vm4, %v1536_v47, %v1538_v40  ;;  %v1783_v53 = vpop.permute.xlu2 %1782  ;;  %vm3024_vm4 = vmmov %vm3022_vm0 }
 0x52c   : > { %2260 = vmatpush.msk.msrb.mxu1 %vm289_vm1, %v1539_v48  ;;  %2262 = vmatpush.msk.msrb.mxu2 %vm289_vm1, %v1540_v49 }
 0x52d   : > { %2261 = vmatmul.msk.f32.vlgmr.msrb.gmra.mxu1 %vm285_vm2, %v2257_v44  ;;  %2263 = vmatmul.msk.f32.vlgmr.msrb.gmra.mxu2 %vm285_vm2, %v2257_v44 }
 0x52e   : > { %2266 = vmatmul.msk.f32.vlgmr.msrb.gmra.mxu3 %vm285_vm2, %v2264_v50  ;;  %2269 = vmatpush.msk.msra.mxu1 %vm289_vm1, %v2778_v14 }
 0x52f   : > { %2268 = vmatmul.msk.f32.vlgmr.msra.gmra.mxu0 %vm285_vm2, %v2264_v50 }
 0x532   : > { %v1702_v51 = vpop.permute.xlu0 %1701  ;;  %v1695_v52 = vpop.permute.xlu1 %1694 }
 0x533   : > { %v1704_v54 = vsel %vm724_vm7, %v1697_v45, %v1702_v51  ;;  %v1698_v55 = vsel %vm715_vm6, %v1693_v46, %v1695_v52  ;;  %v1699_v56 = vsel %vm715_vm6, %v1695_v52, %v1697_v45  ;;  %v1869_v3 = vpop.permute.xlu2 %1868  ;;  %vm3026_vm6 = vcmask 400384  }
 0x534   : > { %2272 = vmatpush.msk.msra.mxu2 %vm289_vm1, %v1698_v55  ;;  %2274 = vmatpush.msk.msra.mxu3 %vm289_vm1, %v1699_v56  ;;  %vm3027_vm7 = vcmask 891904  }
 0x535   : > { %2276 = vmatpush.msk.msrb.mxu0 %vm289_vm1, %v1704_v54  ;;  %2270 = vmatmul.msk.f32.vlgmr.msra.gmra.mxu1 %vm285_vm2, %v2264_v50 }
 0x536   : > { %2273 = vmatmul.msk.f32.vlgmr.msra.gmra.mxu2 %vm285_vm2, %v2271_v57  ;;  %2275 = vmatmul.msk.f32.vlgmr.msra.gmra.mxu3 %vm285_vm2, %v2271_v57 }
 0x537   : > { %2277 = vmatmul.msk.f32.vlgmr.msrb.gmra.mxu0 %vm285_vm2, %v2271_v57 }
 0x53a   : > { %v1785_v58 = vpop.permute.xlu0 %1784  ;;  %v1781_v60 = vpop.permute.xlu1 %1780 }
 0x53b   : > { %v1787_v62 = vsel %vm813_vm8, %v1783_v53, %v1785_v58  ;;  %v1786_v63 = vsel %vm813_vm8, %v1781_v60, %v1783_v53  ;;  %v1878_v9 = vpop.permute.xlu2 %1877  ;;  %vm3028_vm8 = vmmov %vm3027_vm7 }
 0x53c   : > { %2279 = vmatpush.msk.msrb.mxu1 %vm289_vm1, %v1786_v63  ;;  %2281 = vmatpush.msk.msrb.mxu2 %vm289_vm1, %v1787_v62 }
 0x53d   : > { %2280 = vmatmul.msk.f32.vlgmr.msrb.gmra.mxu1 %vm285_vm2, %v2278_v61 }
 0x53e   : > { %2282 = vmatmul.msk.f32.vlgmr.msrb.gmra.mxu2 %vm285_vm2, %v2278_v61 }
 0x542   : > { %v1871_v4 = vpop.permute.xlu0 %1870  ;;  %v1790_v5 = vpop.permute.xlu1 %1789 }
 0x543   : > { %v1874_v7 = vsel %vm3022_vm0, %v1869_v3, %v1871_v4  ;;  %v1792_v8 = vsel %vm3023_vm3, %v1785_v58, %v1790_v5  ;;  %v1961_v14 = vpop.permute.xlu2 %1960 }
 0x544   : > { %2283 = vmatpush.msk.msrb.mxu3 %vm289_vm1, %v1792_v8  ;;  %2286 = vmatpush.msk.msra.mxu0 %vm289_vm1, %v1874_v7 }
 0x545   : > { %2284 = vmatmul.msk.f32.vlgmr.msrb.gmra.mxu3 %vm285_vm2, %v2278_v61  ;;  %2287 = vmatmul.msk.f32.vlgmr.msra.gmra.mxu0 %vm285_vm2, %v2285_v6 }
 0x54a   : > { %v1957_v10 = vpop.permute.xlu0 %1956  ;;  %v1873_v59 = vpop.permute.xlu1 %1872 }
 0x54b   : > { %v1875_v11 = vsel %vm3024_vm4, %v1871_v4, %v1873_v59  ;;  %v1880_v12 = vsel %vm3025_vm5, %v1873_v59, %v1878_v9 }
 0x54c   : > { %2288 = vmatpush.msk.msra.mxu1 %vm289_vm1, %v1875_v11  ;;  %2290 = vmatpush.msk.msra.mxu2 %vm289_vm1, %v1880_v12 }
 0x54d   : > { %2289 = vmatmul.msk.f32.vlgmr.msra.gmra.mxu1 %vm285_vm2, %v2285_v6  ;;  %2291 = vmatmul.msk.f32.vlgmr.msra.gmra.mxu2 %vm285_vm2, %v2285_v6 }
 0x552   : > { %v1966_v15 = vpop.permute.xlu0 %1965  ;;  %v1959_v13 = vpop.permute.xlu1 %1958 }
 0x553   : > { %v1968_v17 = vsel %vm3026_vm6, %v1961_v14, %v1966_v15  ;;  %v1962_v18 = vsel %vm3027_vm7, %v1957_v10, %v1959_v13  ;;  %v1963_v19 = vsel %vm3028_vm8, %v1959_v13, %v1961_v14 }
 0x554   : > { %2293 = vmatpush.msk.msra.mxu3 %vm289_vm1, %v1962_v18  ;;  %2295 = vmatpush.msk.msrb.mxu0 %vm289_vm1, %v1963_v19 }
 0x555   : > { %2297 = vmatpush.msk.msrb.mxu1 %vm289_vm1, %v1968_v17  ;;  %2294 = vmatmul.msk.f32.vlgmr.msra.gmra.mxu3 %vm285_vm2, %v2292_v16 }
 0x556   : > { %2296 = vmatmul.msk.f32.vlgmr.msrb.gmra.mxu0 %vm285_vm2, %v2292_v16  ;;  %2298 = vmatmul.msk.f32.vlgmr.msrb.gmra.mxu1 %vm285_vm2, %v2292_v16  ;;  %vm3029_vm2 = vcmask 551936  }
 0x557   : > { %vm3030_vm15 = vmmov %vm3029_vm2 }
 0x558   : > { %vm3031_vm11 = vmmov %vm3029_vm2 }
 0x588   : > { %v1327_v22 = vpop.f32.mrf.mxu3 }
 0x58a   : > { %v1347_v21 = vpop.f32.mrf.mxu0 }
 0x58b   : > { %v1367_v20 = vpop.f32.mrf.mxu1 }
 0x591   : > { %v1397_v23 = vpop.f32.mrf.mxu2 }
 0x592   : > { %v1437_v27 = vpop.f32.mrf.mxu0  ;;  %v1398_v2 = vadd.f32 %v1397_v23, %v1327_v22 }
 0x593   : > { %v1438_v40 = vadd.f32 %v1437_v27, %v1367_v20 }
 0x598   : > { %v1417_v28 = vpop.f32.mrf.mxu3 }
 0x599   : > { %v1418_v39 = vadd.f32 %v1417_v28, %v1347_v21 }
 0x59a   : > { %v1482_v26 = vpop.f32.mrf.mxu1 }
 0x59b   : > { %v1525_v48 = vadd.f32 %v1482_v26, %v1398_v2 }
 0x5a0   : > { %v1502_v29 = vpop.f32.mrf.mxu2 }
 0x5a1   : > { %v1526_v43 = vadd.f32 %v1502_v29, %v1418_v39 }
 0x5a2   : > { %v1570_v32 = vpop.f32.mrf.mxu0 }
 0x5a3   : > { %v1613_v53 = vadd.f32 %v1570_v32, %v1525_v48 }
 0x5a8   : > { %v1522_v33 = vpop.f32.mrf.mxu3 }
 0x5a9   : > { %v1527_v44 = vadd.f32 %v1522_v33, %v1438_v40 }
 0x5aa   : > { %v1590_v31 = vpop.f32.mrf.mxu1 }
 0x5ab   : > { %v1614_v49 = vadd.f32 %v1590_v31, %v1526_v43 }
 0x5ac   : > { %v1664_v36 = vpop.f32.mrf.mxu0 }
 0x5ad   : > { %v1688_v54 = vadd.f32 %v1664_v36, %v1614_v49 }
 0x5b0   : > { %v1610_v34 = vpop.f32.mrf.mxu2 }
 0x5b1   : > { %v1644_v37 = vpop.f32.mrf.mxu3  ;;  %v1615_v46 = vadd.f32 %v1610_v34, %v1527_v44 }
 0x5b2   : > { %v1684_v35 = vpop.f32.mrf.mxu1  ;;  %v1687_v56 = vadd.f32 %v1644_v37, %v1613_v53 }
 0x5b3   : > { %v1689_v51 = vadd.f32 %v1684_v35, %v1615_v46 }
 0x5b4   : > { %v1772_v42 = vpop.f32.mrf.mxu0 }
 0x5b5   : > { %v1777_v58 = vadd.f32 %v1772_v42, %v1689_v51 }
 0x5b9   : > { %v1732_v38 = vpop.f32.mrf.mxu2  ;;  %v1752_v45 = vpop.f32.mrf.mxu3 }
 0x5ba   : > { %v1820_v41 = vpop.f32.mrf.mxu1  ;;  %v1776_v57 = vadd.f32 %v1752_v45, %v1688_v54  ;;  %v1775_v61 = vadd.f32 %v1732_v38, %v1687_v56 }
 0x5bc   : > { %v1863_v7 = vadd.f32 %v1820_v41, %v1775_v61 }
 0x5c1   : > { %v1840_v47 = vpop.f32.mrf.mxu2 }
 0x5c2   : > { %v1908_v52 = vpop.f32.mrf.mxu0  ;;  %v1864_v62 = vadd.f32 %v1840_v47, %v1776_v57 }
 0x5c3   : > { %v1951_v9 = vadd.f32 %v1908_v52, %v1863_v7 }
 0x5c8   : > { %v1860_v55 = vpop.f32.mrf.mxu3 }
 0x5c9   : > { %v1865_v63 = vadd.f32 %v1860_v55, %v1777_v58 }
 0x5ca   : > { %v1928_v50 = vpop.f32.mrf.mxu1 }
 0x5cb   : > { %v1952_v3 = vadd.f32 %v1928_v50, %v1864_v62 }
 0x5d0   : > { %v1948_v60 = vpop.f32.mrf.mxu2 }
 0x5d1   : > { %v1953_v4 = vadd.f32 %v1948_v60, %v1865_v63 }
 0x5d3   : > { %v2016_v5 = vpop.f32.mrf.mxu0  ;;  %v2036_v6 = vpop.f32.mrf.mxu1 }
 0x5d4   : > { %v2040_v8 = vadd.f32 %v2016_v5, %v1952_v3  ;;  %v2041_v10 = vadd.f32 %v2036_v6, %v1953_v4 }
 0x5d6   : > { %v2043_v11 = vmul.f32 %v2040_v8, %v2743_v25  ;;  %v2044_v14 = vmul.f32 %v2041_v10, %v2745_v30 }
 0x5d8   : > { %v1996_v59 = vpop.f32.mrf.mxu3  ;;  %v2046_v16 = vsel %vm289_vm1, %v2043_v11, 0.0  ;;  %v2048_v18 = vsel %vm3029_vm2, %v2044_v14, 0.0 }
 0x5d9   : > { %v2039_v12 = vadd.f32 %v1996_v59, %v1951_v9 }
 0x5db   : > { %v2042_v15 = vmul.f32 %v2039_v12, %v2741_v24 }
 0x5dd   : > { %v2045_v13 = vsel %vm289_vm1, %v2042_v15, 0.0 }
 0x5de   : > { %v2047_v17 = vadd.f32 %v2046_v16, %v2045_v13 }
 0x5e0   : > { %v2049_v19 = vadd.f32 %v2048_v18, %v2047_v17 }
 0x5e2   : > { %2050 = vadd.xlane.f32.xlu1 %v2049_v19 }
 0x655   : > { %v2051_v20 = vpop.xlane.xlu1 %2050 }
 0x656   : > { %v2052_v21 = vmul.f32 0.00390625, %v2051_v20 }
 0x658   : > { %v2053_v22 = vsub.f32 %v2039_v12, %v2052_v21  ;;  %v2054_v23 = vsub.f32 %v2040_v8, %v2052_v21  ;;  %v2055_v26 = vsub.f32 %v2041_v10, %v2052_v21 }
 0x65a   : > { %v2056_v27 = vmul.f32 %v2053_v22, %v2741_v24  ;;  %v2057_v28 = vmul.f32 %v2054_v23, %v2743_v25  ;;  %v2058_v29 = vmul.f32 %v2055_v26, %v2745_v30 }
 0x65c   : > { %v2059_v31 = vmul.f32 %v2056_v27, %v2056_v27  ;;  %v2060_v32 = vmul.f32 %v2057_v28, %v2057_v28  ;;  %v2061_v33 = vmul.f32 %v2058_v29, %v2058_v29 }
 0x65e   : > { %v2062_v34 = vsel %vm289_vm1, %v2059_v31, 0.0  ;;  %v2063_v35 = vsel %vm289_vm1, %v2060_v32, 0.0  ;;  %v2065_v37 = vsel %vm3030_vm15, %v2061_v33, 0.0 }
 0x65f   : > { %v2064_v36 = vadd.f32 %v2063_v35, %v2062_v34 }
 0x661   : > { %v2066_v38 = vadd.f32 %v2065_v37, %v2064_v36 }
 0x663   : > { %2067 = vadd.xlane.f32.xlu2 %v2066_v38 }
 0x6d6   : > { %v2068_v39 = vpop.xlane.xlu2 %2067 }
 0x6d7   : > { %v2069_v24 = vmul.f32 0.00390625, %v2068_v39 }
 0x6d9   : > { %v2070_v40 = vadd.f32 1e-05, %v2069_v24 }
 0x6db   : > { %2372 = vrsqrt.f32 %v2070_v40  ;;  %vm2077_vm10 = vweird.f32 %v2070_v40 }
 0x6e1   : > { %v2373_v25 = vpop.eup %2372 }
 0x6e2   : > { %v2072_v30 = vmul.f32 %v2373_v25, %v2070_v40  ;;  %vm2078_vm14 = vweird.f32 %v2373_v25 }
 0x6e3   : > { %vm2079_vm9 = vmor %vm2077_vm10, %vm2078_vm14 }
 0x6e4   : > { %v2073_v41 = vmul.f32 %v2373_v25, %v2072_v30 }
 0x6e6   : > { %v2074_v42 = vmul.f32 0.5, %v2073_v41 }
 0x6e8   : > { %v2075_v2 = vsub.f32 1.5, %v2074_v42 }
 0x6ea   : > { %v2076_v43 = vmul.f32 %v2373_v25, %v2075_v2 }
 0x6ec   : > { %v2080_v44 = vsel %vm2079_vm9, %v2373_v25, %v2076_v43 }
 0x6ed   : > { %v2082_v45 = vmul.f32 %v2080_v44, %v2054_v23  ;;  %v2083_v46 = vmul.f32 %v2080_v44, %v2055_v26  ;;  %v2081_v47 = vmul.f32 %v2080_v44, %v2053_v22 }
 0x6ef   : > { %v2086_v48 = vrot.slane %v2082_v45, 4  ;;  %v2090_v49 = vadd.f32 %v2083_v46, %v2547_v0 }
 0x6f1   : > { %v2087_v50 = vsel %vm289_vm1, %v2081_v47, %v2086_v48  ;;  %2092 = vst.msk [vmem:[%s217_s7 + $0x8] sm:$0xf] %vm3031_vm11, %v2090_v49 }
 0x6f2   : > { %v2089_v51 = vadd.f32 %v2087_v50, %v2551_v1 }
 0x6f4   : > { %2091 = vst [vmem:[%s217_s7] sm:$0xff] %v2089_v51 }
 0x6f5   : > { %2401 = shalt.err (!%p2398_p3)
}
 0x6f6   : > { %2305 = dma.vmem_to_hbm [thread:$0]  (%p2532_p5), %s2108_s8, 192, %s2110_s30, %s2094_s22  }
 0x6f7 PF: > { %p2311_p4 = scmp.ge.s32.totalorder %s2436_s21, 2  ;;  %s2121_s16 = sand.u32 1, %s2424_s18  }
 0x6f8   : > { %s2122_s17 = scalar_lea.sflag [#allocation3], %s2121_s16 }
 0x6f9   : > { %p2308_p7 = pnand %p2311_p4, %p2536_p6 }
 0x6fb   : > { %p2309_p8 = pneg %p2308_p7 }
 0x6fd   : > { %2419 = dma.done.wait (%p2309_p8), %s2122_s17, 192  }
 0x6fe   : > { %2421 = vsyncadd (%p2309_p8), %s2122_s17, 4294967104  ;;  %p15_p9 = scmp.ge.s32.totalorder %s2519_s24, 4   ;;  %s3032_s18 = smov %s2428_s19 }
 0x6ff   : > { %s3033_s19 = smov %s2432_s20  ;;  %s3034_s20 = smov %s2530_s27 }
 0x700   : > { %s3035_s21 = smov %s2519_s24  ;;  %17 = sbr.rel (!%p15_p9) target bundleno = 3 (0x3), region = 100 }
 0x705   :  { %2128 = vsyncpa [#allocation3], 1 }
 0x706   :  { %2130 = vsyncpa [#allocation3 + $0x1], 1 }

</bundles_post_ra>
